<compile_context>
chip_gen: v5e
topology: v5e:2x2
jax: 0.10.0
libtpu: 0.0.40
codegen_flags: <defaults>
</compile_context>

<pallas_src>
import math
import functools

import jax
import jax.numpy as jnp
from jax.experimental import pallas as pl
from jax.experimental.pallas import tpu as pltpu

_LN_EPS = 1e-5


def _gelu_tanh(x):
    # GELU(approximate='tanh'):  0.5*x*(1 + tanh(sqrt(2/pi)*(x + 0.044715*x^3)))
    c = math.sqrt(2.0 / math.pi)
    return 0.5 * x * (1.0 + jnp.tanh(c * (x + 0.044715 * x * x * x)))


def _layernorm(x, w, b, eps=_LN_EPS):
    # x: (rows, C) f32, w/b: (1, C) f32
    mean = jnp.mean(x, axis=-1, keepdims=True)
    xc = x - mean
    var = jnp.mean(xc * xc, axis=-1, keepdims=True)
    inv = jax.lax.rsqrt(var + eps)
    return xc * inv * w + b


def block_kernel(x_ref, k_ref, v_ref,
                 ln1_w_ref, ln1_b_ref,
                 wq_ref, bq_ref,
                 wo_ref, bo_ref,
                 ln2_w_ref, ln2_b_ref,
                 w_fc_ref, b_fc_ref,
                 w_mp_ref, b_mp_ref,
                 o_ref,
                 *, n_head: int):
    tq = x_ref.shape[1]
    C = x_ref.shape[2]
    hd = C // n_head
    bf16 = jnp.bfloat16
    f32 = jnp.float32

    # ------------------------------------------------------------------
    # Query tile: LN1 + Q projection (wq/bq pre-scaled by 1/sqrt(hd))
    # ------------------------------------------------------------------
    xq = x_ref[0]                                              # (tq, C) f32
    xq_ln = _layernorm(xq, ln1_w_ref[...], ln1_b_ref[...])
    q = jnp.dot(xq_ln.astype(bf16), wq_ref[...],
                preferred_element_type=f32) + bq_ref[...]      # (tq, C) f32
    # one head-major relayout per tile instead of n_head lane-offset slices
    q_h = q.reshape(tq, n_head, hd).transpose(1, 0, 2).astype(bf16)   # (nh, tq, hd)

    k_h = k_ref[0]                                             # (nh, T, hd) bf16
    v_h = v_ref[0]                                             # (nh, T, hd) bf16

    # ------------------------------------------------------------------
    # Attention (batched over heads on the MXU)
    # ------------------------------------------------------------------
    s = jnp.einsum('htd,hkd->htk', q_h, k_h,
                   preferred_element_type=f32)                 # (nh, tq, T) f32
    s = s - jnp.max(s, axis=-1, keepdims=True)
    p = jnp.exp(s)
    denom = jnp.sum(p, axis=-1, keepdims=True)                 # (nh, tq, 1)
    o_h = jnp.einsum('htk,hkd->htd', p.astype(bf16), v_h,
                     preferred_element_type=f32)               # (nh, tq, hd) f32
    # deferred softmax normalization: scale (nh,tq,hd) instead of (nh,tq,T)
    o_h = o_h * pl.reciprocal(denom, approx=True)

    # single K=C output-projection GEMM (no per-head K=hd matmuls)
    attn = o_h.transpose(1, 0, 2).reshape(tq, C)               # (tq, C) f32
    attn = jnp.dot(attn.astype(bf16), wo_ref[...],
                   preferred_element_type=f32) + bo_ref[...]

    y = xq + attn                                              # first residual

    # ------------------------------------------------------------------
    # MLP branch
    # ------------------------------------------------------------------
    y_ln = _layernorm(y, ln2_w_ref[...], ln2_b_ref[...])
    h1 = jnp.dot(y_ln.astype(bf16), w_fc_ref[...],
                 preferred_element_type=f32) + b_fc_ref[...]   # (tq, 4C)
    h1 = _gelu_tanh(h1)
    h2 = jnp.dot(h1.astype(bf16), w_mp_ref[...],
                 preferred_element_type=f32) + b_mp_ref[...]   # (tq, C)

    o_ref[0] = (y + h2).astype(o_ref.dtype)


def _vmem_limit_bytes():
    # ~80% of physical VMEM, capped at 100 MiB: ~51 MiB on v7x (64 MiB phys),
    # ~100 MiB on v5e/v6e (128 MiB phys).
    try:
        cap = getattr(pltpu.get_tpu_info(), "vmem_capacity_bytes",
                      64 * 1024 * 1024)
    except Exception:
        cap = 64 * 1024 * 1024
    return min(100 * 1024 * 1024, int(cap * 0.8))


def block_forward(x, params, n_head, *, tq=None):
    """x: (B, T, C) float32.  params: dict of f32 weights (see init_params)."""
    B, T, C = x.shape
    assert C % n_head == 0
    hd = C // n_head
    scale = 1.0 / math.sqrt(hd)
    bf16 = jnp.bfloat16

    if tq is None:
        tq = min(T, 512)
    if T % tq != 0:
        tq = T                      # TODO(synk): support ragged T via BoundedSlice
    nq = T // tq

    # ---- one-time weight prep (bf16 for the MXU, scale folded into Q) ----
    w_attn, b_attn = params["w_attn"], params["b_attn"]            # (C,3C), (1,3C)
    w_q = (w_attn[:, 0 * C:1 * C] * scale).astype(bf16)
    w_k = w_attn[:, 1 * C:2 * C]
    w_v = w_attn[:, 2 * C:3 * C]
    b_q = b_attn[:, 0 * C:1 * C] * scale                           # bias stays f32
    b_k = b_attn[:, 1 * C:2 * C]
    b_v = b_attn[:, 2 * C:3 * C]
    w_o = params["w_aproj"].astype(bf16)                           # (C, C)
    b_o = params["b_aproj"]
    w_fc = params["w_fc"].astype(bf16)
    b_fc = params["b_fc"]
    w_mp = params["w_mproj"].astype(bf16)
    b_mp = params["b_mproj"]
    ln1_w, ln1_b = params["ln1_w"], params["ln1_b"]
    ln2_w, ln2_b = params["ln2_w"], params["ln2_b"]

    # ---- LN1 + K/V projections precomputed as plain XLA GEMMs (perf review) ----
    # Keeps the full-sequence f32 x out of VMEM, removes the qi==0 compute spike,
    # and lets both grid axes be parallel.  Delivered head-major (B, nh, T, hd)
    # so per-head access in the kernel is a free leading-axis index.
    x_ln1 = _layernorm(x, ln1_w, ln1_b)                            # (B, T, C) f32
    k = (x_ln1 @ w_k + b_k).reshape(B, T, n_head, hd)
    v = (x_ln1 @ w_v + b_v).reshape(B, T, n_head, hd)
    k_h = k.transpose(0, 2, 1, 3).astype(bf16)                     # (B, nh, T, hd)
    v_h = v.transpose(0, 2, 1, 3).astype(bf16)

    def const_spec(shape):
        # grid-constant block: single-buffer it (no point double-buffering)
        return pl.BlockSpec(shape, lambda b, q: (0,) * len(shape),
                            pipeline_mode=pl.Buffered(1))

    in_specs = [
        pl.BlockSpec((1, tq, C), lambda b, q: (b, q, 0)),          # x query tile
        pl.BlockSpec((1, n_head, T, hd), lambda b, q: (b, 0, 0, 0)),   # K head-major
        pl.BlockSpec((1, n_head, T, hd), lambda b, q: (b, 0, 0, 0)),   # V head-major
        const_spec((1, C)), const_spec((1, C)),                    # ln1 w, b
        const_spec((C, C)), const_spec((1, C)),                    # w_q (scaled), b_q
        const_spec((C, C)), const_spec((1, C)),                    # attn out proj, bias
        const_spec((1, C)), const_spec((1, C)),                    # ln2 w, b
        const_spec((C, 4 * C)), const_spec((1, 4 * C)),            # c_fc W^T, b
        const_spec((4 * C, C)), const_spec((1, C)),                # mlp c_proj W^T, b
    ]
    out_spec = pl.BlockSpec((1, tq, C), lambda b, q: (b, q, 0))

    kernel = functools.partial(block_kernel, n_head=n_head)

    cost = pl.CostEstimate(
        flops=int(B * (20 * T * C * C + 4 * T * T * C)),
        transcendentals=int(B * (n_head * T * T + 4 * T * C)),
        bytes_accessed=int(B * T * C * (4 + 4 + 2 * 2) + 10 * C * C * 2 + 12 * C * 4),
    )

    return pl.pallas_call(
        kernel,
        out_shape=jax.ShapeDtypeStruct((B, T, C), x.dtype),
        grid_spec=pltpu.PrefetchScalarGridSpec(
            num_scalar_prefetch=0,
            grid=(B, nq),
            in_specs=in_specs,
            out_specs=out_spec,
        ),
        compiler_params=pltpu.CompilerParams(
            # no cross-step state anymore -> both axes megacore-parallel
            dimension_semantics=("parallel", "parallel"),
            vmem_limit_bytes=_vmem_limit_bytes(),
        ),
        cost_estimate=cost,
    )(x,
      k_h, v_h,
      ln1_w, ln1_b,
      w_q, b_q,
      w_o, b_o,
      ln2_w, ln2_b,
      w_fc, b_fc, w_mp, b_mp)


def init_params(key, n_embd):
    """Deterministic synthetic init.  Linear weights stored pre-transposed
    as (in_features, out_features); biases & LN params as (1, dim).  All f32."""
    C = n_embd
    ks = jax.random.split(key, 8)

    def lin(k, fan_in, fan_out):
        bound = 1.0 / math.sqrt(fan_in)
        kw, kb = jax.random.split(k)
        w = jax.random.uniform(kw, (fan_in, fan_out), jnp.float32, -bound, bound)
        b = jax.random.uniform(kb, (1, fan_out), jnp.float32, -bound, bound)
        return w, b

    w_attn, b_attn = lin(ks[0], C, 3 * C)
    w_aproj, b_aproj = lin(ks[1], C, C)
    w_fc, b_fc = lin(ks[2], C, 4 * C)
    w_mproj, b_mproj = lin(ks[3], 4 * C, C)

    return dict(
        ln1_w=jnp.ones((1, C), jnp.float32),
        ln1_b=jnp.zeros((1, C), jnp.float32),
        w_attn=w_attn, b_attn=b_attn,
        w_aproj=w_aproj, b_aproj=b_aproj,
        ln2_w=jnp.ones((1, C), jnp.float32),
        ln2_b=jnp.zeros((1, C), jnp.float32),
        w_fc=w_fc, b_fc=b_fc,
        w_mproj=w_mproj, b_mproj=b_mproj,
    )


def block_reference(x, params, n_head):
    """Pure-JAX f32 reference reproducing the PyTorch forward semantics."""
    B, T, C = x.shape
    hd = C // n_head

    def ln(x, w, b):
        m = jnp.mean(x, -1, keepdims=True)
        v = jnp.mean((x - m) ** 2, -1, keepdims=True)
        return (x - m) * jax.lax.rsqrt(v + 1e-5) * w + b

    xln = ln(x, params["ln1_w"][0], params["ln1_b"][0])
    qkv = xln @ params["w_attn"] + params["b_attn"][0]
    q, k, v = jnp.split(qkv, 3, axis=-1)
    q = q.reshape(B, T, n_head, hd).transpose(0, 2, 1, 3)
    k = k.reshape(B, T, n_head, hd).transpose(0, 2, 1, 3)
    v = v.reshape(B, T, n_head, hd).transpose(0, 2, 1, 3)
    s = jnp.einsum("bhqd,bhkd->bhqk", q, k) / math.sqrt(hd)
    p = jax.nn.softmax(s, axis=-1)
    a = jnp.einsum("bhqk,bhkd->bhqd", p, v)
    a = a.transpose(0, 2, 1, 3).reshape(B, T, C)
    a = a @ params["w_aproj"] + params["b_aproj"][0]
    y = x + a
    yln = ln(y, params["ln2_w"][0], params["ln2_b"][0])
    h = yln @ params["w_fc"] + params["b_fc"][0]
    h = _gelu_tanh(h)
    h = h @ params["w_mproj"] + params["b_mproj"][0]
    return y + h


if __name__ == "__main__":
    B, T, C, n_head = 2, 16, 32, 4

    key = jax.random.PRNGKey(0)
    kx, kp = jax.random.split(key)
    x = jax.random.normal(kx, (B, T, C), jnp.float32)
    params = init_params(kp, C)

    ref = block_reference(x, params, n_head)

    # single q-tile per batch element (nq = 1)
    out1 = jax.block_until_ready(block_forward(x, params, n_head, tq=T))
    # two q-tiles per batch element (exercises the q-tiling path)
    out2 = jax.block_until_ready(block_forward(x, params, n_head, tq=T // 2))

    assert out1.shape == (B, T, C) and out2.shape == (B, T, C)
    # bf16 MXU operands + approx reciprocal -> loosen tolerance vs f32 reference
    assert jnp.allclose(out1, ref, atol=5e-2, rtol=5e-2), float(jnp.max(jnp.abs(out1 - ref)))
    assert jnp.allclose(out2, ref, atol=5e-2, rtol=5e-2), float(jnp.max(jnp.abs(out2 - ref)))

    print("KERNEL_OK")
</pallas_src>

<mosaic_0001>
module attributes {stable_mosaic.version = 11 : i64} {
  func.func @block_kernel(%arg0: i32, %arg1: i32, %arg2: memref<1x16x32xf32, #tpu.memory_space<vmem>>, %arg3: memref<1x4x16x8xbf16, #tpu.memory_space<vmem>>, %arg4: memref<1x4x16x8xbf16, #tpu.memory_space<vmem>>, %arg5: memref<1x32xf32, #tpu.memory_space<vmem>>, %arg6: memref<1x32xf32, #tpu.memory_space<vmem>>, %arg7: memref<32x32xbf16, #tpu.memory_space<vmem>>, %arg8: memref<1x32xf32, #tpu.memory_space<vmem>>, %arg9: memref<32x32xbf16, #tpu.memory_space<vmem>>, %arg10: memref<1x32xf32, #tpu.memory_space<vmem>>, %arg11: memref<1x32xf32, #tpu.memory_space<vmem>>, %arg12: memref<1x32xf32, #tpu.memory_space<vmem>>, %arg13: memref<32x128xbf16, #tpu.memory_space<vmem>>, %arg14: memref<1x128xf32, #tpu.memory_space<vmem>>, %arg15: memref<128x32xbf16, #tpu.memory_space<vmem>>, %arg16: memref<1x32xf32, #tpu.memory_space<vmem>>, %arg17: memref<1x16x32xf32, #tpu.memory_space<vmem>>) attributes {dimension_semantics = [#tpu.dimension_semantics<parallel>, #tpu.dimension_semantics<parallel>], iteration_bounds = array<i64: 2, 1>, scalar_prefetch = 0 : i64, scratch_operands = 0 : i64, tpu.core_type = #tpu.core_type<tc>, window_params = [{transform_indices = @transform_0, window_bounds = array<i64: 1, 16, 32>}, {transform_indices = @transform_1, window_bounds = array<i64: 1, 4, 16, 8>}, {transform_indices = @transform_2, window_bounds = array<i64: 1, 4, 16, 8>}, {pipeline_mode = #tpu.pipeline_mode<synchronous>, transform_indices = @transform_3, window_bounds = array<i64: 1, 32>}, {pipeline_mode = #tpu.pipeline_mode<synchronous>, transform_indices = @transform_4, window_bounds = array<i64: 1, 32>}, {pipeline_mode = #tpu.pipeline_mode<synchronous>, transform_indices = @transform_5, window_bounds = array<i64: 32, 32>}, {pipeline_mode = #tpu.pipeline_mode<synchronous>, transform_indices = @transform_6, window_bounds = array<i64: 1, 32>}, {pipeline_mode = #tpu.pipeline_mode<synchronous>, transform_indices = @transform_7, window_bounds = array<i64: 32, 32>}, {pipeline_mode = #tpu.pipeline_mode<synchronous>, transform_indices = @transform_8, window_bounds = array<i64: 1, 32>}, {pipeline_mode = #tpu.pipeline_mode<synchronous>, transform_indices = @transform_9, window_bounds = array<i64: 1, 32>}, {pipeline_mode = #tpu.pipeline_mode<synchronous>, transform_indices = @transform_10, window_bounds = array<i64: 1, 32>}, {pipeline_mode = #tpu.pipeline_mode<synchronous>, transform_indices = @transform_11, window_bounds = array<i64: 32, 128>}, {pipeline_mode = #tpu.pipeline_mode<synchronous>, transform_indices = @transform_12, window_bounds = array<i64: 1, 128>}, {pipeline_mode = #tpu.pipeline_mode<synchronous>, transform_indices = @transform_13, window_bounds = array<i64: 128, 32>}, {pipeline_mode = #tpu.pipeline_mode<synchronous>, transform_indices = @transform_14, window_bounds = array<i64: 1, 32>}, {transform_indices = @transform_15, window_bounds = array<i64: 1, 16, 32>}]} {
    %c0 = arith.constant 0 : index
    %c0_0 = arith.constant 0 : index
    %c0_1 = arith.constant 0 : index
    %0 = vector.load %arg2[%c0, %c0_0, %c0_1] : memref<1x16x32xf32, #tpu.memory_space<vmem>>, vector<1x16x32xf32>
    %1 = vector.shape_cast %0 : vector<1x16x32xf32> to vector<16x32xf32>
    %c0_2 = arith.constant 0 : index
    %c0_3 = arith.constant 0 : index
    %2 = vector.load %arg5[%c0_2, %c0_3] : memref<1x32xf32, #tpu.memory_space<vmem>>, vector<1x32xf32>
    %c0_4 = arith.constant 0 : index
    %c0_5 = arith.constant 0 : index
    %3 = vector.load %arg6[%c0_4, %c0_5] : memref<1x32xf32, #tpu.memory_space<vmem>>, vector<1x32xf32>
    %cst = arith.constant dense<0.000000e+00> : vector<16xf32>
    %4 = vector.multi_reduction <add>, %1, %cst [1] : vector<16x32xf32> to vector<16xf32>
    %5 = vector.shape_cast %4 : vector<16xf32> to vector<16x1xf32>
    %cst_6 = arith.constant 3.200000e+01 : f32
    %6 = vector.broadcast %cst_6 : f32 to vector<16x1xf32>
    %7 = arith.divf %5, %6 : vector<16x1xf32>
    %8 = vector.broadcast %7 : vector<16x1xf32> to vector<16x32xf32>
    %9 = arith.subf %1, %8 : vector<16x32xf32>
    %10 = arith.mulf %9, %9 : vector<16x32xf32>
    %cst_7 = arith.constant dense<0.000000e+00> : vector<16xf32>
    %11 = vector.multi_reduction <add>, %10, %cst_7 [1] : vector<16x32xf32> to vector<16xf32>
    %12 = vector.shape_cast %11 : vector<16xf32> to vector<16x1xf32>
    %cst_8 = arith.constant 3.200000e+01 : f32
    %13 = vector.broadcast %cst_8 : f32 to vector<16x1xf32>
    %14 = arith.divf %12, %13 : vector<16x1xf32>
    %cst_9 = arith.constant 9.99999974E-6 : f32
    %15 = vector.broadcast %cst_9 : f32 to vector<16x1xf32>
    %16 = arith.addf %14, %15 : vector<16x1xf32>
    %17 = math.rsqrt %16 : vector<16x1xf32>
    %18 = vector.broadcast %17 : vector<16x1xf32> to vector<16x32xf32>
    %19 = arith.mulf %9, %18 : vector<16x32xf32>
    %20 = vector.broadcast %2 : vector<1x32xf32> to vector<16x32xf32>
    %21 = arith.mulf %19, %20 : vector<16x32xf32>
    %22 = vector.broadcast %3 : vector<1x32xf32> to vector<16x32xf32>
    %23 = arith.addf %21, %22 : vector<16x32xf32>
    %24 = arith.truncf %23 : vector<16x32xf32> to vector<16x32xbf16>
    %c0_10 = arith.constant 0 : index
    %c0_11 = arith.constant 0 : index
    %25 = vector.load %arg7[%c0_10, %c0_11] : memref<32x32xbf16, #tpu.memory_space<vmem>>, vector<32x32xbf16>
    %cst_12 = arith.constant dense<0.000000e+00> : vector<16x32xf32>
    %26 = tpu.matmul %24, %25, %cst_12 {dimension_numbers = #tpu.dot_dimension_numbers<[1], [0], [0], [1], [0, 0, 1, 1], [], []>} : vector<16x32xbf16>, vector<32x32xbf16>, vector<16x32xf32> -> vector<16x32xf32>
    %c0_13 = arith.constant 0 : index
    %c0_14 = arith.constant 0 : index
    %27 = vector.load %arg8[%c0_13, %c0_14] : memref<1x32xf32, #tpu.memory_space<vmem>>, vector<1x32xf32>
    %28 = vector.broadcast %27 : vector<1x32xf32> to vector<16x32xf32>
    %29 = arith.addf %26, %28 : vector<16x32xf32>
    %30 = vector.shape_cast %29 : vector<16x32xf32> to vector<16x4x8xf32>
    %31 = tpu.transpose %30, [1, 0, 2] : vector<16x4x8xf32> -> vector<4x16x8xf32>
    %32 = arith.truncf %31 : vector<4x16x8xf32> to vector<4x16x8xbf16>
    %c0_15 = arith.constant 0 : index
    %c0_16 = arith.constant 0 : index
    %c0_17 = arith.constant 0 : index
    %c0_18 = arith.constant 0 : index
    %33 = vector.load %arg3[%c0_15, %c0_16, %c0_17, %c0_18] : memref<1x4x16x8xbf16, #tpu.memory_space<vmem>>, vector<1x4x16x8xbf16>
    %34 = vector.shape_cast %33 : vector<1x4x16x8xbf16> to vector<4x16x8xbf16>
    %c0_19 = arith.constant 0 : index
    %c0_20 = arith.constant 0 : index
    %c0_21 = arith.constant 0 : index
    %c0_22 = arith.constant 0 : index
    %35 = vector.load %arg4[%c0_19, %c0_20, %c0_21, %c0_22] : memref<1x4x16x8xbf16, #tpu.memory_space<vmem>>, vector<1x4x16x8xbf16>
    %36 = vector.shape_cast %35 : vector<1x4x16x8xbf16> to vector<4x16x8xbf16>
    "tpu.trace_start"() <{level = 10 : i32, message = "htd,hkd->htk"}> : () -> ()
    %cst_23 = arith.constant dense<0.000000e+00> : vector<4x16x16xf32>
    %37 = tpu.matmul %32, %34, %cst_23 {dimension_numbers = #tpu.dot_dimension_numbers<[2], [2], [1], [1], [0, 0, 0, 1, 1, 1], [0], [0]>} : vector<4x16x8xbf16>, vector<4x16x8xbf16>, vector<4x16x16xf32> -> vector<4x16x16xf32>
    "tpu.trace_stop"() : () -> ()
    %cst_24 = arith.constant dense<0xFF800000> : vector<4x16xf32>
    %38 = vector.multi_reduction <maximumf>, %37, %cst_24 [2] : vector<4x16x16xf32> to vector<4x16xf32>
    %39 = vector.shape_cast %38 : vector<4x16xf32> to vector<4x16x1xf32>
    %40 = vector.broadcast %39 : vector<4x16x1xf32> to vector<4x16x16xf32>
    %41 = arith.subf %37, %40 : vector<4x16x16xf32>
    %42 = math.exp %41 : vector<4x16x16xf32>
    %cst_25 = arith.constant dense<0.000000e+00> : vector<4x16xf32>
    %43 = vector.multi_reduction <add>, %42, %cst_25 [2] : vector<4x16x16xf32> to vector<4x16xf32>
    %44 = vector.shape_cast %43 : vector<4x16xf32> to vector<4x16x1xf32>
    %45 = arith.truncf %42 : vector<4x16x16xf32> to vector<4x16x16xbf16>
    "tpu.trace_start"() <{level = 10 : i32, message = "htk,hkd->htd"}> : () -> ()
    %cst_26 = arith.constant dense<0.000000e+00> : vector<4x16x8xf32>
    %46 = tpu.matmul %45, %36, %cst_26 {dimension_numbers = #tpu.dot_dimension_numbers<[2], [1], [1], [2], [0, 0, 0, 1, 1, 2], [0], [0]>} : vector<4x16x16xbf16>, vector<4x16x8xbf16>, vector<4x16x8xf32> -> vector<4x16x8xf32>
    "tpu.trace_stop"() : () -> ()
    %47 = tpu.reciprocal %44 {approx = true} : vector<4x16x1xf32> -> vector<4x16x1xf32>
    %48 = vector.broadcast %47 : vector<4x16x1xf32> to vector<4x16x8xf32>
    %49 = arith.mulf %46, %48 : vector<4x16x8xf32>
    %50 = tpu.transpose %49, [1, 0, 2] : vector<4x16x8xf32> -> vector<16x4x8xf32>
    %51 = vector.shape_cast %50 : vector<16x4x8xf32> to vector<16x32xf32>
    %52 = arith.truncf %51 : vector<16x32xf32> to vector<16x32xbf16>
    %c0_27 = arith.constant 0 : index
    %c0_28 = arith.constant 0 : index
    %53 = vector.load %arg9[%c0_27, %c0_28] : memref<32x32xbf16, #tpu.memory_space<vmem>>, vector<32x32xbf16>
    %cst_29 = arith.constant dense<0.000000e+00> : vector<16x32xf32>
    %54 = tpu.matmul %52, %53, %cst_29 {dimension_numbers = #tpu.dot_dimension_numbers<[1], [0], [0], [1], [0, 0, 1, 1], [], []>} : vector<16x32xbf16>, vector<32x32xbf16>, vector<16x32xf32> -> vector<16x32xf32>
    %c0_30 = arith.constant 0 : index
    %c0_31 = arith.constant 0 : index
    %55 = vector.load %arg10[%c0_30, %c0_31] : memref<1x32xf32, #tpu.memory_space<vmem>>, vector<1x32xf32>
    %56 = vector.broadcast %55 : vector<1x32xf32> to vector<16x32xf32>
    %57 = arith.addf %54, %56 : vector<16x32xf32>
    %58 = arith.addf %1, %57 : vector<16x32xf32>
    %c0_32 = arith.constant 0 : index
    %c0_33 = arith.constant 0 : index
    %59 = vector.load %arg11[%c0_32, %c0_33] : memref<1x32xf32, #tpu.memory_space<vmem>>, vector<1x32xf32>
    %c0_34 = arith.constant 0 : index
    %c0_35 = arith.constant 0 : index
    %60 = vector.load %arg12[%c0_34, %c0_35] : memref<1x32xf32, #tpu.memory_space<vmem>>, vector<1x32xf32>
    %cst_36 = arith.constant dense<0.000000e+00> : vector<16xf32>
    %61 = vector.multi_reduction <add>, %58, %cst_36 [1] : vector<16x32xf32> to vector<16xf32>
    %62 = vector.shape_cast %61 : vector<16xf32> to vector<16x1xf32>
    %cst_37 = arith.constant 3.200000e+01 : f32
    %63 = vector.broadcast %cst_37 : f32 to vector<16x1xf32>
    %64 = arith.divf %62, %63 : vector<16x1xf32>
    %65 = vector.broadcast %64 : vector<16x1xf32> to vector<16x32xf32>
    %66 = arith.subf %58, %65 : vector<16x32xf32>
    %67 = arith.mulf %66, %66 : vector<16x32xf32>
    %cst_38 = arith.constant dense<0.000000e+00> : vector<16xf32>
    %68 = vector.multi_reduction <add>, %67, %cst_38 [1] : vector<16x32xf32> to vector<16xf32>
    %69 = vector.shape_cast %68 : vector<16xf32> to vector<16x1xf32>
    %cst_39 = arith.constant 3.200000e+01 : f32
    %70 = vector.broadcast %cst_39 : f32 to vector<16x1xf32>
    %71 = arith.divf %69, %70 : vector<16x1xf32>
    %cst_40 = arith.constant 9.99999974E-6 : f32
    %72 = vector.broadcast %cst_40 : f32 to vector<16x1xf32>
    %73 = arith.addf %71, %72 : vector<16x1xf32>
    %74 = math.rsqrt %73 : vector<16x1xf32>
    %75 = vector.broadcast %74 : vector<16x1xf32> to vector<16x32xf32>
    %76 = arith.mulf %66, %75 : vector<16x32xf32>
    %77 = vector.broadcast %59 : vector<1x32xf32> to vector<16x32xf32>
    %78 = arith.mulf %76, %77 : vector<16x32xf32>
    %79 = vector.broadcast %60 : vector<1x32xf32> to vector<16x32xf32>
    %80 = arith.addf %78, %79 : vector<16x32xf32>
    %81 = arith.truncf %80 : vector<16x32xf32> to vector<16x32xbf16>
    %c0_41 = arith.constant 0 : index
    %c0_42 = arith.constant 0 : index
    %82 = vector.load %arg13[%c0_41, %c0_42] : memref<32x128xbf16, #tpu.memory_space<vmem>>, vector<32x128xbf16>
    %cst_43 = arith.constant dense<0.000000e+00> : vector<16x128xf32>
    %83 = tpu.matmul %81, %82, %cst_43 {dimension_numbers = #tpu.dot_dimension_numbers<[1], [0], [0], [1], [0, 0, 1, 1], [], []>} : vector<16x32xbf16>, vector<32x128xbf16>, vector<16x128xf32> -> vector<16x128xf32>
    %c0_44 = arith.constant 0 : index
    %c0_45 = arith.constant 0 : index
    %84 = vector.load %arg14[%c0_44, %c0_45] : memref<1x128xf32, #tpu.memory_space<vmem>>, vector<1x128xf32>
    %85 = vector.broadcast %84 : vector<1x128xf32> to vector<16x128xf32>
    %86 = arith.addf %83, %85 : vector<16x128xf32>
    %cst_46 = arith.constant 5.000000e-01 : f32
    %87 = vector.broadcast %cst_46 : f32 to vector<16x128xf32>
    %88 = arith.mulf %87, %86 : vector<16x128xf32>
    %cst_47 = arith.constant 4.471500e-02 : f32
    %89 = vector.broadcast %cst_47 : f32 to vector<16x128xf32>
    %90 = arith.mulf %89, %86 : vector<16x128xf32>
    %91 = arith.mulf %90, %86 : vector<16x128xf32>
    %92 = arith.mulf %91, %86 : vector<16x128xf32>
    %93 = arith.addf %86, %92 : vector<16x128xf32>
    %cst_48 = arith.constant 0.797884583 : f32
    %94 = vector.broadcast %cst_48 : f32 to vector<16x128xf32>
    %95 = arith.mulf %94, %93 : vector<16x128xf32>
    %96 = math.tanh %95 : vector<16x128xf32>
    %cst_49 = arith.constant 1.000000e+00 : f32
    %97 = vector.broadcast %cst_49 : f32 to vector<16x128xf32>
    %98 = arith.addf %97, %96 : vector<16x128xf32>
    %99 = arith.mulf %88, %98 : vector<16x128xf32>
    %100 = arith.truncf %99 : vector<16x128xf32> to vector<16x128xbf16>
    %c0_50 = arith.constant 0 : index
    %c0_51 = arith.constant 0 : index
    %101 = vector.load %arg15[%c0_50, %c0_51] : memref<128x32xbf16, #tpu.memory_space<vmem>>, vector<128x32xbf16>
    %cst_52 = arith.constant dense<0.000000e+00> : vector<16x32xf32>
    %102 = tpu.matmul %100, %101, %cst_52 {dimension_numbers = #tpu.dot_dimension_numbers<[1], [0], [0], [1], [0, 0, 1, 1], [], []>} : vector<16x128xbf16>, vector<128x32xbf16>, vector<16x32xf32> -> vector<16x32xf32>
    %c0_53 = arith.constant 0 : index
    %c0_54 = arith.constant 0 : index
    %103 = vector.load %arg16[%c0_53, %c0_54] : memref<1x32xf32, #tpu.memory_space<vmem>>, vector<1x32xf32>
    %104 = vector.broadcast %103 : vector<1x32xf32> to vector<16x32xf32>
    %105 = arith.addf %102, %104 : vector<16x32xf32>
    %106 = arith.addf %58, %105 : vector<16x32xf32>
    %c0_55 = arith.constant 0 : index
    %c0_56 = arith.constant 0 : index
    %c0_57 = arith.constant 0 : index
    %107 = vector.load %arg17[%c0_55, %c0_56, %c0_57] : memref<1x16x32xf32, #tpu.memory_space<vmem>>, vector<1x16x32xf32>
    %108 = vector.shape_cast %107 : vector<1x16x32xf32> to vector<16x32xf32>
    %109 = vector.shape_cast %106 : vector<16x32xf32> to vector<1x16x32xf32>
    tpu.vector_store %arg17[%c0_55, %c0_56, %c0_57], %109 {strides = array<i32>} : memref<1x16x32xf32, #tpu.memory_space<vmem>>, vector<1x16x32xf32>,
    return
  }
  func.func @transform_0(%arg0: i32, %arg1: i32) -> (i32, i32, i32) {
    %c0_i32 = arith.constant 0 : i32
    %c0_i32_0 = arith.constant 0 : i32
    return %arg0, %arg1, %c0_i32 : i32, i32, i32
  }
  func.func @transform_1(%arg0: i32, %arg1: i32) -> (i32, i32, i32, i32) {
    %c0_i32 = arith.constant 0 : i32
    %c0_i32_0 = arith.constant 0 : i32
    %c0_i32_1 = arith.constant 0 : i32
    %c0_i32_2 = arith.constant 0 : i32
    return %arg0, %c0_i32, %c0_i32_0, %c0_i32_1 : i32, i32, i32, i32
  }
  func.func @transform_2(%arg0: i32, %arg1: i32) -> (i32, i32, i32, i32) {
    %c0_i32 = arith.constant 0 : i32
    %c0_i32_0 = arith.constant 0 : i32
    %c0_i32_1 = arith.constant 0 : i32
    %c0_i32_2 = arith.constant 0 : i32
    return %arg0, %c0_i32, %c0_i32_0, %c0_i32_1 : i32, i32, i32, i32
  }
  func.func @transform_3(%arg0: i32, %arg1: i32) -> (i32, i32) {
    %c0_i32 = arith.constant 0 : i32
    %c0_i32_0 = arith.constant 0 : i32
    %c0_i32_1 = arith.constant 0 : i32
    return %c0_i32, %c0_i32_0 : i32, i32
  }
  func.func @transform_4(%arg0: i32, %arg1: i32) -> (i32, i32) {
    %c0_i32 = arith.constant 0 : i32
    %c0_i32_0 = arith.constant 0 : i32
    %c0_i32_1 = arith.constant 0 : i32
    return %c0_i32, %c0_i32_0 : i32, i32
  }
  func.func @transform_5(%arg0: i32, %arg1: i32) -> (i32, i32) {
    %c0_i32 = arith.constant 0 : i32
    %c0_i32_0 = arith.constant 0 : i32
    %c0_i32_1 = arith.constant 0 : i32
    return %c0_i32, %c0_i32_0 : i32, i32
  }
  func.func @transform_6(%arg0: i32, %arg1: i32) -> (i32, i32) {
    %c0_i32 = arith.constant 0 : i32
    %c0_i32_0 = arith.constant 0 : i32
    %c0_i32_1 = arith.constant 0 : i32
    return %c0_i32, %c0_i32_0 : i32, i32
  }
  func.func @transform_7(%arg0: i32, %arg1: i32) -> (i32, i32) {
    %c0_i32 = arith.constant 0 : i32
    %c0_i32_0 = arith.constant 0 : i32
    %c0_i32_1 = arith.constant 0 : i32
    return %c0_i32, %c0_i32_0 : i32, i32
  }
  func.func @transform_8(%arg0: i32, %arg1: i32) -> (i32, i32) {
    %c0_i32 = arith.constant 0 : i32
    %c0_i32_0 = arith.constant 0 : i32
    %c0_i32_1 = arith.constant 0 : i32
    return %c0_i32, %c0_i32_0 : i32, i32
  }
  func.func @transform_9(%arg0: i32, %arg1: i32) -> (i32, i32) {
    %c0_i32 = arith.constant 0 : i32
    %c0_i32_0 = arith.constant 0 : i32
    %c0_i32_1 = arith.constant 0 : i32
    return %c0_i32, %c0_i32_0 : i32, i32
  }
  func.func @transform_10(%arg0: i32, %arg1: i32) -> (i32, i32) {
    %c0_i32 = arith.constant 0 : i32
    %c0_i32_0 = arith.constant 0 : i32
    %c0_i32_1 = arith.constant 0 : i32
    return %c0_i32, %c0_i32_0 : i32, i32
  }
  func.func @transform_11(%arg0: i32, %arg1: i32) -> (i32, i32) {
    %c0_i32 = arith.constant 0 : i32
    %c0_i32_0 = arith.constant 0 : i32
    %c0_i32_1 = arith.constant 0 : i32
    return %c0_i32, %c0_i32_0 : i32, i32
  }
  func.func @transform_12(%arg0: i32, %arg1: i32) -> (i32, i32) {
    %c0_i32 = arith.constant 0 : i32
    %c0_i32_0 = arith.constant 0 : i32
    %c0_i32_1 = arith.constant 0 : i32
    return %c0_i32, %c0_i32_0 : i32, i32
  }
  func.func @transform_13(%arg0: i32, %arg1: i32) -> (i32, i32) {
    %c0_i32 = arith.constant 0 : i32
    %c0_i32_0 = arith.constant 0 : i32
    %c0_i32_1 = arith.constant 0 : i32
    return %c0_i32, %c0_i32_0 : i32, i32
  }
  func.func @transform_14(%arg0: i32, %arg1: i32) -> (i32, i32) {
    %c0_i32 = arith.constant 0 : i32
    %c0_i32_0 = arith.constant 0 : i32
    %c0_i32_1 = arith.constant 0 : i32
    return %c0_i32, %c0_i32_0 : i32, i32
  }
  func.func @transform_15(%arg0: i32, %arg1: i32) -> (i32, i32, i32) {
    %c0_i32 = arith.constant 0 : i32
    %c0_i32_0 = arith.constant 0 : i32
    return %arg0, %arg1, %c0_i32 : i32, i32, i32
  }
}

</mosaic_0001>

<bundles_post_ra>
// kernel: tpu_custom_call.1
= control target key start
LH: loop header
LB: loop body
LE: loop exit
PB: predicated region body
PF: predicated region fallthrough
CT: control target
= control target key end

     0   :  { %s2766_s0 = inlined_call_operand.vmem [shape: f32[2,16,32], index: 0, kind: input, shape index: {}]   ;;  %s2767_s1 = inlined_call_operand.vmem [shape: bf16[2,4,16,8], index: 1, kind: input, shape index: {}]   ;;  %s2768_s2 = inlined_call_operand.vmem [shape: bf16[2,4,16,8], index: 2, kind: input, shape index: {}]   ;;  %s2769_s3 = inlined_call_operand.vmem [shape: f32[1,32], index: 3, kind: input, shape index: {}]   ;;  %s2770_s4 = inlined_call_operand.vmem [shape: f32[1,32], index: 4, kind: input, shape index: {}]   ;;  %s2771_s5 = inlined_call_operand.vmem [shape: bf16[32,32], index: 5, kind: input, shape index: {}]   ;;  %s2772_s6 = inlined_call_operand.vmem [shape: f32[1,32], index: 6, kind: input, shape index: {}]   ;;  %s2773_s7 = inlined_call_operand.vmem [shape: bf16[32,32], index: 7, kind: input, shape index: {}]   ;;  %s2774_s8 = inlined_call_operand.vmem [shape: f32[1,32], index: 8, kind: input, shape index: {}]   ;;  %s2775_s9 = inlined_call_operand.vmem [shape: f32[1,32], index: 9, kind: input, shape index: {}]   ;;  %s2776_s10 = inlined_call_operand.vmem [shape: f32[1,32], index: 10, kind: input, shape index: {}]   ;;  %s2777_s11 = inlined_call_operand.vmem [shape: bf16[32,128], index: 11, kind: input, shape index: {}]   ;;  %s2778_s12 = inlined_call_operand.vmem [shape: f32[1,128], index: 12, kind: input, shape index: {}]   ;;  %s2779_s13 = inlined_call_operand.vmem [shape: bf16[128,32], index: 13, kind: input, shape index: {}]   ;;  %s2780_s14 = inlined_call_operand.vmem [shape: f32[1,32], index: 14, kind: input, shape index: {}]   ;;  %s2781_s15 = inlined_call_operand.hbm [shape: f32[2,16,32], index: 15, kind: output, shape index: {}]  }
   0x1   :  { %2785 = sst [smem:[#allocation7_spill]] %s2766_s0 }
   0x2   :  { %2786 = sst [smem:[#allocation8_spill]] %s2769_s3 }
   0x3   :  { %2787 = sst [smem:[#allocation9_spill]] %s2770_s4 }
   0x4   :  { %2788 = sst [smem:[#allocation10_spill]] %s2771_s5 }
   0x5   :  { %20 = vsyncpa [#allocation3], 0 }
   0x6   :  { %22 = vsyncpa [#allocation3 + $0x1], 0  ;;  %s2338_s18 = smov 0   ;;  %s2340_s19 = smov 0  }
   0x7   :  { %s2342_s20 = smov 0   ;;  %s2344_s21 = smov 0  }
   0x8   :  { %s2346_s22 = smov 0   ;;  %s2348_s23 = smov 0  }
   0x9 LB: > { %2789 = sst [smem:[#allocation5_spill]] %s2242_s22  ;;  %s1875_s24 = sadd.s32 4294967295, %s2246_s23   ;;  %s2246_s23 = sphi %s2348_s23, %s28_s23   ;;  %s2242_s22 = sphi %s2346_s22, %s2799_s22   ;;  %s2238_s21 = sphi %s2344_s21, %s2798_s21   ;;  %s2234_s20 = sphi %s2342_s20, %s2802_s20   ;;  %s2230_s19 = sphi %s2340_s19, %s2801_s19   ;;  %s2226_s18 = sphi %s2338_s18, %s2800_s18  }
   0xa   : > { %s1876_s25 = sadd.s32 4294967294, %s2246_s23   ;;  %s40_s26 = sadd.s32 1, %s2242_s22 }
   0xb   : > { %s381_s27 = sadd.s32 1, %s2234_s20  ;;  %p42_p0 = scmp.ge.s32.totalorder %s40_s26, 2 }
   0xc   : > { %p391_p1 = scmp.ne.s32.totalorder %s2234_s20, %s2230_s19  ;;  %p392_p2 = scmp.eq.s32.totalorder %s1875_s24, 1 }
   0xd   : > { %p397_p3 = scmp.ne.s32.totalorder %s2230_s19, %s2226_s18  ;;  %s2804_s26 = smov (%p42_p0, %s40_s26), 0 }
   0xe   : > { %2790 = sst [smem:[#allocation6_spill]] %s2804_s26  ;;  %p2378_p4 = por %p392_p2, %p391_p1 }
   0xf   : > { %p398_p5 = scmp.eq.s32.totalorder %s1876_s25, 1  ;;  %s376_s29 = ssub.s32 %s2242_s22, %s2804_s26 }
  0x10   : > { %p1879_p6 = scmp.ge.s32.totalorder %s2246_s23, 1  ;;  %p379_p7 = scmp.eq.s32.totalorder %s376_s29, 0 }
  0x11   : > { %p2385_p8 = por %p398_p5, %p397_p3  ;;  %p481_p9 = scmp.lt.s32.totalorder %s2246_s23, 3 }
  0x12   : > { %s2391_s16 = scalar_select %p379_p7, %s2234_s20, %s381_s27  }
  0x13   : > { %p482_p10 = pnand %p1879_p6, %p481_p9 }
  0x14   : > { %p544_p11 = scmp.lt.s32.totalorder (!%p482_p10), %s2238_s21, 1  ;;  %s2793_s0 = sld [smem:[#allocation7_spill]] (!%p482_p10) }
  0x15   : > { %485 = sbr.rel (%p482_p10) target bundleno = 1908 (0x774), region = 80  ;;  %s2794_s5 = sld [smem:[#allocation10_spill]] (!%p482_p10) }
  0x16   : > { %s2795_s3 = sld [smem:[#allocation8_spill]] (!%p482_p10)  ;;  %s2251_s25 = smov (!%p482_p10), 112  }
  0x17   : > { %s2796_s4 = sld [smem:[#allocation9_spill]] (!%p482_p10) }
  0x1a   : > { %s2395_s17 = scalar_select %p544_p11, %s2238_s21, 1  ;;  %vm569_vm0 = vcmask 261120   ;;  %v2248_v4 = vmov 32.0   ;;  %v2114_v53 = vld [vmem:[%s2772_s6] ss:$0 sm:$0xff]  ;;  %vm944_vm8 = vcmask 64512  }
  0x1b   : > { %2120 = vrcp.f32 %v2248_v4  ;;  %v1995_v21 = vld [vmem:[%s2794_s5 + $0x8] sm:$0xff]  ;;  %v1994_v23 = vld [vmem:[%s2794_s5] sm:$0xff]  ;;  %vm690_vm9 = vcmask 1047556   ;;  %vm1055_vm10 = vcmask 130048   ;;  %vm1512_vm11 = vcmask 195584  }
  0x1c   : > { %s1991_s24 = sshll.u32 %s2395_s17, 4  ;;  %661 = vmatpush.bf16.msra.mxu0 %v1995_v21  ;;  %v2112_v42 = vld [vmem:[%s2795_s3] ss:$0 sm:$0xff]  ;;  %s1992_s3 = sshll.u32 %s2395_s17, 5 }
  0x1d   : > { %s2401_s29 = scalar_lea.vmem %s2793_s0, %s1991_s24  ;;  %v2113_v47 = vld [vmem:[%s2796_s4] ss:$0 sm:$0xff]  ;;  %s2249_s0 = smov 104  }
  0x1e   : > { %v565_v0 = vld [vmem:[%s2401_s29] sm:$0xff]  ;;  %v566_v2 = vld [vmem:[%s2401_s29 + $0x8] sm:$0xff]  ;;  %s2250_s24 = smov 120   ;;  %s557_s22 = scalar_lea.vmem %s2767_s1, %s1992_s3 }
  0x1f   : > { %v570_v1 = vsel %vm569_vm0, %v565_v0, 0.0  ;;  %v573_v3 = vsel %vm569_vm0, %v566_v2, 0.0  ;;  %v1998_v59 = vld [vmem:[%s557_s22 + $0x10] sm:$0xff]  ;;  %v1996_v60 = vld [vmem:[%s557_s22] sm:$0xff]  ;;  %v1999_v61 = vld [vmem:[%s557_s22 + $0x18] sm:$0xff]  ;;  %s2548_s5 = scalar_lea.vmem %s2768_s2, %s1992_s3  ;;  %s2254_s3 = smov 16  }
  0x20   : > { %571 = vadd.xlane.f32.xlu0 %v570_v1  ;;  %662 = vmatpush.bf16.msra.mxu0 %v1994_v23  ;;  %v1997_v62 = vld [vmem:[%s557_s22 + $0x8] sm:$0xff]  ;;  %v949_v1 = vsel %vm944_vm8, %v1996_v60, 0  ;;  %s2255_s22 = smov 24   ;;  %s2784_s17 = smov 8  }
  0x21   : > { %v2121_v5 = vpop.eup %2120  ;;  %958 = vmatpush.bf16.xpose.msra.mxu1 %v949_v1 }
  0x22   : > { %v577_v6 = vmul.f32 32.0, %v2121_v5  ;;  %vm581_vm1 = vweird.f32 %v2121_v5 }
  0x24   : > { %v578_v7 = vsub.f32 1.0, %v577_v6  ;;  %v2252_v6 = vmov 1983009808  }
  0x26   : > { %v579_v8 = vmul.f32 %v2121_v5, %v578_v7  ;;  %v695_v7 = vunpack.c.l.s4 %v2252_v6 }
  0x28   : > { %574 = vadd.xlane.f32.xlu0 %v573_v3  ;;  %v580_v9 = vadd.f32 %v2121_v5, %v579_v8  ;;  %v979_v3 = vsel %vm944_vm8, %v1997_v62, 0 }
  0x29   : > { %988 = vmatpush.bf16.xpose.msra.mxu2 %v979_v3 }
  0x2a   : > { %v2407_v10 = vsel %vm581_vm1, %v2121_v5, %v580_v9 }
  0x93   : > { %v572_v11 = vpop.xlane.xlu0 %571 }
  0x94   : > { %v583_v12 = vmul.f32 %v2407_v10, %v572_v11 }
  0x96   : > { %v585_v13 = vsub.f32 %v565_v0, %v583_v12  ;;  %v1009_v0 = vsel %vm944_vm8, %v1998_v59, 0 }
  0x97   : > { %1018 = vmatpush.bf16.xpose.msra.mxu3 %v1009_v0 }
  0x98   : > { %v587_v14 = vmul.f32 %v585_v13, %v585_v13 }
  0x9a   : > { %v589_v15 = vsel %vm569_vm0, %v587_v14, 0.0  ;;  %v2441_v14 = vunpack.c.0.s8 %v695_v7 }
  0x9b   : > { %590 = vadd.xlane.f32.xlu1 %v589_v15  ;;  %v575_v16 = vpop.xlane.xlu0 %574 }
  0x9c   : > { %v584_v17 = vmul.f32 %v2407_v10, %v575_v16 }
  0x9e   : > { %v586_v18 = vsub.f32 %v566_v2, %v584_v17  ;;  %v1039_v2 = vsel %vm944_vm8, %v1999_v61, 0 }
  0x9f   : > { %1048 = vmatpush.bf16.xpose.msrb.mxu0 %v1039_v2 }
  0xa0   : > { %v588_v19 = vmul.f32 %v586_v18, %v586_v18 }
  0xa2   : > { %v592_v20 = vsel %vm569_vm0, %v588_v19, 0.0  ;;  %v2253_v19 = vmov 1934713408  }
  0xa3   : > { %593 = vadd.xlane.f32.xlu1 %v592_v20  ;;  %v719_v20 = vunpack.c.l.s4 %v2253_v19 }
 0x10e   : > { %v591_v22 = vpop.xlane.xlu1 %590 }
 0x10f   : > { %v595_v24 = vmul.f32 %v591_v22, %v2407_v10 }
 0x111   : > { %v597_v25 = vadd.f32 1e-05, %v595_v24 }
 0x113   : > { %2122 = vrsqrt.f32 %v597_v25  ;;  %vm605_vm3 = vweird.f32 %v597_v25 }
 0x116   : > { %v594_v26 = vpop.xlane.xlu1 %593 }
 0x117   : > { %v596_v27 = vmul.f32 %v594_v26, %v2407_v10 }
 0x119   : > { %v2123_v28 = vpop.eup %2122  ;;  %v598_v29 = vadd.f32 1e-05, %v596_v27 }
 0x11a   : > { %v600_v30 = vmul.f32 %v2123_v28, %v597_v25  ;;  %vm606_vm2 = vweird.f32 %v2123_v28 }
 0x11b   : > { %2124 = vrsqrt.f32 %v598_v29  ;;  %vm607_vm4 = vmor %vm605_vm3, %vm606_vm2  ;;  %vm615_vm6 = vweird.f32 %v598_v29 }
 0x11c   : > { %v601_v31 = vmul.f32 %v2123_v28, %v600_v30 }
 0x11e   : > { %v602_v32 = vmul.f32 0.5, %v601_v31  ;;  %v2451_v31 = vunpack.c.0.s8 %v719_v20 }
 0x120   : > { %v603_v33 = vsub.f32 1.5, %v602_v32 }
 0x121   : > { %v2125_v34 = vpop.eup %2124 }
 0x122   : > { %v604_v35 = vmul.f32 %v2123_v28, %v603_v33  ;;  %v610_v36 = vmul.f32 %v2125_v34, %v598_v29  ;;  %vm616_vm5 = vweird.f32 %v2125_v34 }
 0x123   : > { %vm617_vm7 = vmor %vm615_vm6, %vm616_vm5 }
 0x124   : > { %v611_v37 = vmul.f32 %v2125_v34, %v610_v36  ;;  %v608_v38 = vsel %vm607_vm4, %v2123_v28, %v604_v35 }
 0x125   : > { %v619_v41 = vmul.f32 %v608_v38, %v585_v13 }
 0x126   : > { %v612_v39 = vmul.f32 0.5, %v611_v37 }
 0x127   : > { %v624_v46 = vmul.f32 %v2112_v42, %v619_v41 }
 0x128   : > { %v613_v40 = vsub.f32 1.5, %v612_v39 }
 0x129   : > { %v629_v49 = vadd.f32 %v2113_v47, %v624_v46 }
 0x12a   : > { %v614_v43 = vmul.f32 %v2125_v34, %v613_v40 }
 0x12c   : > { %v618_v44 = vsel %vm617_vm7, %v2125_v34, %v614_v43 }
 0x12d   : > { %v620_v45 = vmul.f32 %v618_v44, %v586_v18 }
 0x12f   : > { %v625_v48 = vmul.f32 %v2112_v42, %v620_v45 }
 0x131   : > { %v630_v50 = vadd.f32 %v2113_v47, %v625_v48 }
 0x133   : > { %v631_v51 = vpack.c.bf16 %v630_v50, %v629_v49 }
 0x135   : > { %1895 = vmatmul.msk.bf16.vlgmr.msra.gmra.mxu0 %vm569_vm0, %v631_v51 }
 0x1b2   : > { %v664_v52 = vpop.f32.mrf.mxu0 }
 0x1b3   : > { %v665_v55 = vadd.f32 %v2114_v53, %v664_v52 }
 0x1b5   : > { %v692_v11 = vrot.slane %v665_v55, 4 }
 0x1ba   : > { %v666_v54 = vpop.f32.mrf.mxu0 }
 0x1bb   : > { %v667_v56 = vadd.f32 %v2114_v53, %v666_v54 }
 0x1bd   : > { %v2092_v57 = vpack.i.bf16 %v667_v56, %v665_v55  ;;  %v748_v15 = vrot.slane %v667_v56, 4 }
 0x1bf   : > { %2093 = vrot.lane.b32.xlu0 %v2092_v57, %s2249_s0  ;;  %2083 = vrot.lane.b32.xlu2 %v2092_v57, %s2250_s24  ;;  %s540_s24 = sand.u32 1, %s2230_s19  }
 0x1c0   : > { %s1880_s4 = sshll.u32 %s540_s24, 4 }
 0x1c7   : > { %2088 = vrot.lane.b32.xlu2 %v2092_v57, %s2251_s25 }
 0x219   : > { %v2084_v58 = vpop.permute.xlu2 %2083 }
 0x21a   : > { %v2086_v12 = vunpack.i.h.bf16 %v2084_v58  ;;  %v2085_v13 = vunpack.i.l.bf16 %v2084_v58 }
 0x21c   : > { %v760_v22 = vrot.slane %v2086_v12, 4  ;;  %v704_v23 = vrot.slane %v2085_v13, 4 }
 0x221   : > { %v2089_v63 = vpop.permute.xlu2 %2088 }
 0x222   : > { %v2090_v4 = vunpack.i.l.bf16 %v2089_v63  ;;  %v2091_v5 = vunpack.i.h.bf16 %v2089_v63 }
 0x224   : > { %v689_v8 = vrot.slane %v2090_v4, 4  ;;  %v746_v9 = vrot.slane %v2091_v5, 4  ;;  %v693_v16 = vsel %vm690_vm9, %v2090_v4, %v692_v11  ;;  %v749_v17 = vsel %vm690_vm9, %v2091_v5, %v748_v15 }
 0x225   : > { %v701_v24 = vperm.slane %v693_v16, %v2441_v14  ;;  %v757_v26 = vperm.slane %v749_v17, %v2441_v14 }
 0x226   : > { %v691_v18 = vsel %vm690_vm9, %v689_v8, %v665_v55  ;;  %v747_v21 = vsel %vm690_vm9, %v746_v9, %v667_v56 }
 0x227   : > { %v697_v27 = vperm.slane %v691_v18, %v2441_v14  ;;  %v753_v30 = vperm.slane %v747_v21, %v2441_v14  ;;  %v728_v36 = vrot.slane %v701_v24, 4  ;;  %v784_v39 = vrot.slane %v757_v26, 4 }
 0x229   : > { %v716_v40 = vrot.slane %v697_v27, 4  ;;  %v772_v47 = vrot.slane %v753_v30, 4 }
 0x231   : > { %v2094_v25 = vpop.permute.xlu0 %2093 }
 0x232   : > { %v2096_v28 = vunpack.i.h.bf16 %v2094_v25  ;;  %v2095_v29 = vunpack.i.l.bf16 %v2094_v25 }
 0x234   : > { %v758_v32 = vrot.slane %v2096_v28, 4  ;;  %v702_v33 = vrot.slane %v2095_v29, 4  ;;  %v705_v34 = vsel %vm690_vm9, %v2095_v29, %v704_v23  ;;  %v761_v35 = vsel %vm690_vm9, %v2096_v28, %v760_v22 }
 0x235   : > { %v713_v37 = vperm.slane %v705_v34, %v2441_v14  ;;  %v769_v38 = vperm.slane %v761_v35, %v2441_v14 }
 0x236   : > { %v703_v41 = vsel %vm690_vm9, %v702_v33, %v2085_v13  ;;  %v759_v42 = vsel %vm690_vm9, %v758_v32, %v2086_v12 }
 0x237   : > { %v709_v43 = vperm.slane %v703_v41, %v2441_v14  ;;  %v726_v44 = vrot.slane %v713_v37, 4  ;;  %v729_v45 = vsel %vm690_vm9, %v713_v37, %v728_v36  ;;  %v765_v46 = vperm.slane %v759_v42, %v2441_v14 }
 0x238   : > { %v737_v48 = vperm.slane %v729_v45, %v2451_v31  ;;  %v782_v49 = vrot.slane %v769_v38, 4  ;;  %v785_v50 = vsel %vm690_vm9, %v769_v38, %v784_v39 }
 0x239   : > { %v714_v51 = vrot.slane %v709_v43, 4  ;;  %v717_v52 = vsel %vm690_vm9, %v709_v43, %v716_v40  ;;  %v727_v53 = vsel %vm690_vm9, %v726_v44, %v701_v24  ;;  %v770_v54 = vrot.slane %v765_v46, 4 }
 0x23a   : > { %v725_v55 = vperm.slane %v717_v52, %v2451_v31  ;;  %v733_v56 = vperm.slane %v727_v53, %v2451_v31  ;;  %v744_v57 = vrot.slane %v737_v48, 4  ;;  %v773_v58 = vsel %vm690_vm9, %v765_v46, %v772_v47 }
 0x23b   : > { %v715_v59 = vsel %vm690_vm9, %v714_v51, %v697_v27  ;;  %v771_v60 = vsel %vm690_vm9, %v770_v54, %v753_v30  ;;  %v781_v61 = vperm.slane %v773_v58, %v2451_v31  ;;  %v783_v62 = vsel %vm690_vm9, %v782_v49, %v757_v26 }
 0x23c   : > { %v721_v63 = vperm.slane %v715_v59, %v2451_v31  ;;  %v740_v0 = vrot.slane %v725_v55, 4  ;;  %v742_v1 = vrot.slane %v733_v56, 4  ;;  %v745_v2 = vsel %vm690_vm9, 0.0, %v744_v57 }
 0x23d   : > { %v777_v3 = vperm.slane %v771_v60, %v2451_v31  ;;  %v789_v4 = vperm.slane %v783_v62, %v2451_v31  ;;  %v793_v5 = vperm.slane %v785_v50, %v2451_v31  ;;  %v796_v6 = vrot.slane %v781_v61, 4 }
 0x23e   : > { %v738_v7 = vrot.slane %v721_v63, 4  ;;  %v741_v8 = vsel %vm690_vm9, 0.0, %v740_v0  ;;  %v743_v9 = vsel %vm690_vm9, 0.0, %v742_v1  ;;  %v813_v11 = vsel %vm690_vm9, %v744_v57, %v733_v56 }
 0x23f   : > { %v794_v12 = vrot.slane %v777_v3, 4  ;;  %v797_v13 = vsel %vm690_vm9, 0.0, %v796_v6  ;;  %v798_v15 = vrot.slane %v789_v4, 4  ;;  %v800_v16 = vrot.slane %v793_v5, 4 }
 0x240   : > { %v807_v17 = vrot.slane %v741_v8, 4  ;;  %v817_v18 = vperm.slane %v813_v11, %v2441_v14  ;;  %v818_v19 = vrot.slane %v745_v2, 4  ;;  %v861_v20 = vrot.slane %v797_v13, 4 }
 0x241   : > { %v799_v21 = vsel %vm690_vm9, 0.0, %v798_v15  ;;  %v801_v22 = vsel %vm690_vm9, 0.0, %v800_v16  ;;  %v867_v23 = vsel %vm690_vm9, %v800_v16, %v789_v4  ;;  %v739_v24 = vsel %vm690_vm9, 0.0, %v738_v7 }
 0x242   : > { %v871_v25 = vperm.slane %v867_v23, %v2441_v14  ;;  %v872_v26 = vrot.slane %v801_v22, 4  ;;  %v795_v27 = vsel %vm690_vm9, 0.0, %v794_v12  ;;  %v802_v28 = vsel %vm690_vm9, %v740_v0, %v721_v63 }
 0x243   : > { %v806_v29 = vperm.slane %v802_v28, %v2441_v14  ;;  %v808_v30 = vsel %vm690_vm9, %v807_v17, %v739_v24  ;;  %v819_v32 = vsel %vm690_vm9, %v818_v19, %v743_v9  ;;  %v838_v33 = vrot.slane %v817_v18, 4 }
 0x244   : > { %v812_v34 = vperm.slane %v808_v30, %v2441_v14  ;;  %v823_v35 = vperm.slane %v819_v32, %v2441_v14  ;;  %v856_v36 = vsel %vm690_vm9, %v796_v6, %v777_v3  ;;  %v862_v37 = vsel %vm690_vm9, %v861_v20, %v795_v27 }
 0x245   : > { %v826_v38 = vrot.slane %v806_v29, 4  ;;  %v860_v39 = vperm.slane %v856_v36, %v2441_v14  ;;  %v866_v40 = vperm.slane %v862_v37, %v2441_v14  ;;  %v873_v41 = vsel %vm690_vm9, %v872_v26, %v799_v21 }
 0x246   : > { %v839_v42 = vsel %vm690_vm9, %v823_v35, %v838_v33  ;;  %v877_v43 = vperm.slane %v873_v41, %v2441_v14  ;;  %v892_v44 = vrot.slane %v871_v25, 4  ;;  %v824_v45 = vrot.slane %v812_v34, 4 }
 0x247   : > { %v827_v46 = vsel %vm690_vm9, %v812_v34, %v826_v38  ;;  %v847_v47 = vperm.slane %v839_v42, %v2451_v31  ;;  %v880_v48 = vrot.slane %v860_v39, 4  ;;  %v836_v49 = vrot.slane %v823_v35, 4 }
 0x248   : > { %v835_v50 = vperm.slane %v827_v46, %v2451_v31  ;;  %v893_v51 = vsel %vm690_vm9, %v877_v43, %v892_v44  ;;  %v825_v52 = vsel %vm690_vm9, %v824_v45, %v806_v29  ;;  %v878_v53 = vrot.slane %v866_v40, 4 }
 0x249   : > { %v852_v54 = vrot.slane %v847_v47, 4  ;;  %v881_v55 = vsel %vm690_vm9, %v866_v40, %v880_v48  ;;  %v901_v56 = vperm.slane %v893_v51, %v2451_v31  ;;  %v831_v57 = vperm.slane %v825_v52, %v2451_v31 }
 0x24a   : > { %v854_v58 = vrot.slane %v835_v50, 4  ;;  %v889_v59 = vperm.slane %v881_v55, %v2451_v31  ;;  %v837_v60 = vsel %vm690_vm9, %v836_v49, %v817_v18  ;;  %v879_v61 = vsel %vm690_vm9, %v878_v53, %v860_v39 }
 0x24b   : > { %v853_v62 = vsel %vm690_vm9, %v852_v54, %v835_v50  ;;  %v906_v63 = vrot.slane %v901_v56, 4  ;;  %v843_v0 = vperm.slane %v837_v60, %v2451_v31  ;;  %v885_v1 = vperm.slane %v879_v61, %v2451_v31  ;;  %v2000_v61 = vld [vmem:[%s2548_s5] sm:$0xff] }
 0x24c   : > { %v908_v2 = vrot.slane %v889_v59, 4  ;;  %v914_v3 = vpack.c.bf16 %v853_v62, %v853_v62  ;;  %v890_v4 = vrot.slane %v877_v43, 4  ;;  %v855_v5 = vsel %vm690_vm9, %v847_v47, %v854_v58  ;;  %1157 = vmatpush.bf16.msrb.mxu1 %v2000_v61 }
 0x24d   : > { %v907_v6 = vsel %vm690_vm9, %v906_v63, %v889_v59  ;;  %v848_v7 = vrot.slane %v843_v0, 4  ;;  %v916_v8 = vpack.c.bf16 %v855_v5, %v855_v5  ;;  %v850_v9 = vrot.slane %v831_v57, 4 }
 0x24e   : > { %v915_v11 = vpack.c.bf16 %v907_v6, %v907_v6  ;;  %v997_v12 = vunpack.c.l.b16 %v914_v3  ;;  %v891_v13 = vsel %vm690_vm9, %v890_v4, %v871_v25  ;;  %v909_v15 = vsel %vm690_vm9, %v901_v56, %v908_v2  ;;  %v2002_v56 = vld [vmem:[%s2548_s5 + $0x10] sm:$0xff]  ;;  %v2001_v6 = vld [vmem:[%s2548_s5 + $0x8] sm:$0xff] }
 0x24f   : > { %v849_v16 = vsel %vm690_vm9, %v848_v7, %v831_v57  ;;  %v897_v17 = vperm.slane %v891_v13, %v2451_v31  ;;  %v917_v18 = vpack.c.bf16 %v909_v15, %v909_v15  ;;  %v1027_v19 = vunpack.c.l.b16 %v916_v8  ;;  %1213 = vmatpush.bf16.msrb.mxu3 %v2002_v56  ;;  %1185 = vmatpush.bf16.msrb.mxu2 %v2001_v6 }
 0x250   : > { %v998_v20 = vunpack.c.l.b16 %v915_v11  ;;  %v910_v21 = vpack.c.bf16 %v849_v16, %v849_v16  ;;  %v851_v22 = vsel %vm690_vm9, %v843_v0, %v850_v9  ;;  %v904_v23 = vrot.slane %v885_v1, 4 }
 0x251   : > { %v902_v24 = vrot.slane %v897_v17, 4  ;;  %v1028_v26 = vunpack.c.l.b16 %v917_v18  ;;  %v912_v27 = vpack.c.bf16 %v851_v22, %v851_v22 }
 0x252   : > { %v999_v28 = vpack.c.b16 %v998_v20, %v997_v12  ;;  %v905_v29 = vsel %vm690_vm9, %v897_v17, %v904_v23  ;;  %v936_v35 = vunpack.c.l.b16 %v910_v21  ;;  %v2003_v20 = vld [vmem:[%s2548_s5 + $0x18] sm:$0xff]  ;;  %s542_s5 = scalar_lea.vmem [#allocation2], %s1880_s4 }
 0x253   : > { %v903_v25 = vsel %vm690_vm9, %v902_v24, %v885_v1  ;;  %v1029_v30 = vpack.c.b16 %v1028_v26, %v1027_v19  ;;  %v913_v32 = vpack.c.bf16 %v905_v29, %v905_v29  ;;  %v967_v33 = vunpack.c.l.b16 %v912_v27  ;;  %1241 = vmatpush.bf16.msra.mxu0 %v2003_v20  ;;  %s1769_s27 = sshll.u32 %s542_s5, 4  ;;  %s1770_s27 = int_to_ptr.vmem [resolvable:$true] %s1769_s27 }
 0x254   : > { %1910 = vmatmul.msk.bf16.vlgmr.msra.gmra.mxu3 %vm944_vm8, %v999_v28  ;;  %v911_v34 = vpack.c.bf16 %v903_v25, %v903_v25 }
 0x255   : > { %1915 = vmatmul.msk.bf16.vlgmr.msrb.gmra.mxu0 %vm944_vm8, %v1029_v30  ;;  %v968_v36 = vunpack.c.l.b16 %v913_v32 }
 0x256   : > { %v937_v37 = vunpack.c.l.b16 %v911_v34 }
 0x257   : > { %v969_v38 = vpack.c.b16 %v968_v36, %v967_v33 }
 0x258   : > { %v938_v39 = vpack.c.b16 %v937_v37, %v936_v35 }
 0x259   : > { %1905 = vmatmul.msk.bf16.vlgmr.msra.gmra.mxu2 %vm944_vm8, %v969_v38 }
 0x25a   : > { %1900 = vmatmul.msk.bf16.vlgmr.msra.gmra.mxu1 %vm944_vm8, %v938_v39 }
 0x2d2   : > { %v1050_v50 = vpop.f32.mrf.mxu0 }
 0x2d3   : > { %v1074_v51 = vsel %vm1055_vm10, %v1050_v50, -inf }
 0x2d7   : > { %v960_v40 = vpop.f32.mrf.mxu1  ;;  %v1020_v41 = vpop.f32.mrf.mxu3 }
 0x2d8   : > { %v1056_v42 = vsel %vm1055_vm10, %v960_v40, -inf  ;;  %v1068_v43 = vsel %vm1055_vm10, %v1020_v41, -inf }
 0x2d9   : > { %1057 = vmax.xlane.f32.xlu0 %v1056_v42  ;;  %1069 = vmax.xlane.f32.xlu1 %v1068_v43 }
 0x2da   : > { %v2539_v54 = vpop.f32.mrf.mxu0 }
 0x2db   : > { %v1077_v55 = vsel %vm1055_vm10, %v2539_v54, -inf }
 0x2dc   : > { %v2531_v44 = vpop.f32.mrf.mxu2 }
 0x2dd   : > { %v1062_v47 = vsel %vm1055_vm10, %v2531_v44, -inf }
 0x2df   : > { %v1022_v45 = vpop.f32.mrf.mxu3  ;;  %v962_v48 = vpop.f32.mrf.mxu1 }
 0x2e0   : > { %v1071_v46 = vsel %vm1055_vm10, %v1022_v45, -inf  ;;  %v1059_v49 = vsel %vm1055_vm10, %v962_v48, -inf }
 0x2e1   : > { %1072 = vmax.xlane.f32.xlu2 %v1071_v46  ;;  %1063 = vmax.xlane.f32.xlu1 %v1062_v47 }
 0x2e4   : > { %v992_v52 = vpop.f32.mrf.mxu2 }
 0x2e5   : > { %v1065_v53 = vsel %vm1055_vm10, %v992_v52, -inf }
 0x2e9   : > { %1060 = vmax.xlane.f32.xlu1 %v1059_v49 }
 0x2f1   : > { %1075 = vmax.xlane.f32.xlu1 %v1074_v51 }
 0x2f9   : > { %1066 = vmax.xlane.f32.xlu1 %v1065_v53 }
 0x301   : > { %1078 = vmax.xlane.f32.xlu1 %v1077_v55 }
 0x34c   : > { %v1058_v57 = vpop.xlane.xlu0 %1057  ;;  %v1070_v58 = vpop.xlane.xlu1 %1069 }
 0x34d   : > { %v1080_v59 = vsub.f32 %v960_v40, %v1058_v57  ;;  %v1084_v60 = vsub.f32 %v1020_v41, %v1070_v58 }
 0x34f   : > { %v1088_v62 = vmul.f32 1.442695, %v1080_v59  ;;  %v1096_v63 = vmul.f32 1.442695, %v1084_v60 }
 0x351   : > { %2126 = vpow2.f32 %v1088_v62 }
 0x352   : > { %2128 = vpow2.f32 %v1096_v63 }
 0x354   : > { %v1073_v0 = vpop.xlane.xlu2 %1072  ;;  %v1064_v1 = vpop.xlane.xlu1 %1063 }
 0x355   : > { %v1085_v2 = vsub.f32 %v1022_v45, %v1073_v0  ;;  %v1082_v21 = vsub.f32 %v2531_v44, %v1064_v1 }
 0x357   : > { %v2127_v3 = vpop.eup %2126  ;;  %v1098_v4 = vmul.f32 1.442695, %v1085_v2  ;;  %v1092_v29 = vmul.f32 1.442695, %v1082_v21 }
 0x358   : > { %v1104_v5 = vsel %vm1055_vm10, %v2127_v3, 0.0  ;;  %v2129_v7 = vpop.eup %2128  ;;  %v1128_v23 = vpack.c.bf16 %v2127_v3, %v2127_v3 }
 0x359   : > { %2130 = vpow2.f32 %v1098_v4  ;;  %1105 = vadd.xlane.f32.xlu2 %v1104_v5  ;;  %v1132_v11 = vpack.c.bf16 %v2129_v7, %v2129_v7  ;;  %v1116_v47 = vsel %vm1055_vm10, %v2129_v7, 0.0 }
 0x35a   : > { %v1138_v25 = vunpack.c.l.b16 %v1128_v23 }
 0x35b   : > { %v1194_v16 = vunpack.c.l.b16 %v1132_v11 }
 0x35c   : > { %v1061_v8 = vpop.xlane.xlu1 %1060 }
 0x35d   : > { %v1081_v9 = vsub.f32 %v962_v48, %v1061_v8 }
 0x35f   : > { %v2131_v12 = vpop.eup %2130  ;;  %v1090_v13 = vmul.f32 1.442695, %v1081_v9 }
 0x360   : > { %v1133_v15 = vpack.c.bf16 %v2131_v12, %v2131_v12  ;;  %v1119_v37 = vsel %vm1055_vm10, %v2131_v12, 0.0 }
 0x361   : > { %2132 = vpow2.f32 %v1090_v13 }
 0x362   : > { %v1195_v17 = vunpack.c.l.b16 %v1133_v15 }
 0x364   : > { %v1076_v18 = vpop.xlane.xlu1 %1075  ;;  %v1196_v19 = vpack.c.b16 %v1195_v17, %v1194_v16 }
 0x365   : > { %v1086_v22 = vsub.f32 %v1050_v50, %v1076_v18 }
 0x366   : > { %1930 = vmatmul.msk.bf16.vlgmr.msrb.gmra.mxu3 %vm1055_vm10, %v1196_v19 }
 0x367   : > { %v2133_v24 = vpop.eup %2132  ;;  %v1100_v26 = vmul.f32 1.442695, %v1086_v22 }
 0x368   : > { %v1129_v27 = vpack.c.bf16 %v2133_v24, %v2133_v24  ;;  %v1107_v28 = vsel %vm1055_vm10, %v2133_v24, 0.0 }
 0x369   : > { %2134 = vpow2.f32 %v1100_v26  ;;  %1108 = vadd.xlane.f32.xlu1 %v1107_v28 }
 0x36a   : > { %v1139_v30 = vunpack.c.l.b16 %v1129_v27  ;;  %2136 = vpow2.f32 %v1092_v29 }
 0x36c   : > { %v1067_v32 = vpop.xlane.xlu1 %1066  ;;  %v1140_v33 = vpack.c.b16 %v1139_v30, %v1138_v25 }
 0x36d   : > { %v1083_v34 = vsub.f32 %v992_v52, %v1067_v32 }
 0x36e   : > { %1920 = vmatmul.msk.bf16.vlgmr.msrb.gmra.mxu1 %vm1055_vm10, %v1140_v33 }
 0x36f   : > { %v2135_v35 = vpop.eup %2134  ;;  %v1094_v36 = vmul.f32 1.442695, %v1083_v34 }
 0x370   : > { %v1122_v38 = vsel %vm1055_vm10, %v2135_v35, 0.0  ;;  %v2137_v39 = vpop.eup %2136  ;;  %v1134_v51 = vpack.c.bf16 %v2135_v35, %v2135_v35 }
 0x371   : > { %2138 = vpow2.f32 %v1094_v36  ;;  %1120 = vadd.xlane.f32.xlu1 %v1119_v37  ;;  %1123 = vadd.xlane.f32.xlu2 %v1122_v38  ;;  %v1130_v42 = vpack.c.bf16 %v2137_v39, %v2137_v39  ;;  %v1110_v46 = vsel %vm1055_vm10, %v2137_v39, 0.0 }
 0x372   : > { %v1222_v56 = vunpack.c.l.b16 %v1134_v51 }
 0x373   : > { %v1166_v48 = vunpack.c.l.b16 %v1130_v42 }
 0x374   : > { %v1079_v40 = vpop.xlane.xlu1 %1078 }
 0x375   : > { %v1087_v41 = vsub.f32 %v2539_v54, %v1079_v40 }
 0x377   : > { %v2139_v43 = vpop.eup %2138  ;;  %v1102_v44 = vmul.f32 1.442695, %v1087_v41 }
 0x378   : > { %v1131_v45 = vpack.c.bf16 %v2139_v43, %v2139_v43  ;;  %v1113_v54 = vsel %vm1055_vm10, %v2139_v43, 0.0 }
 0x379   : > { %2140 = vpow2.f32 %v1102_v44  ;;  %1111 = vadd.xlane.f32.xlu1 %v1110_v46  ;;  %1117 = vadd.xlane.f32.xlu2 %v1116_v47 }
 0x37a   : > { %v1167_v49 = vunpack.c.l.b16 %v1131_v45 }
 0x37c   : > { %v1168_v50 = vpack.c.b16 %v1167_v49, %v1166_v48 }
 0x37e   : > { %1925 = vmatmul.msk.bf16.vlgmr.msrb.gmra.mxu2 %vm1055_vm10, %v1168_v50 }
 0x37f   : > { %v2141_v52 = vpop.eup %2140 }
 0x380   : > { %v1135_v53 = vpack.c.bf16 %v2141_v52, %v2141_v52  ;;  %v1125_v55 = vsel %vm1055_vm10, %v2141_v52, 0.0 }
 0x381   : > { %1114 = vadd.xlane.f32.xlu2 %v1113_v54  ;;  %1126 = vadd.xlane.f32.xlu0 %v1125_v55 }
 0x382   : > { %v1223_v57 = vunpack.c.l.b16 %v1135_v53 }
 0x384   : > { %v1224_v58 = vpack.c.b16 %v1223_v57, %v1222_v56 }
 0x386   : > { %1935 = vmatmul.msk.bf16.vlgmr.msra.gmra.mxu0 %vm1055_vm10, %v1224_v58 }
 0x3cc   : > { %v1106_v59 = vpop.xlane.xlu2 %1105 }
 0x3dc   : > { %v1109_v60 = vpop.xlane.xlu1 %1108 }
 0x3e4   : > { %v1124_v61 = vpop.xlane.xlu2 %1123  ;;  %v1121_v62 = vpop.xlane.xlu1 %1120 }
 0x3e9   : > { %v1215_v0 = vpop.f32.mrf.mxu3 }
 0x3eb   : > { %v1159_v1 = vpop.f32.mrf.mxu1 }
 0x3ec   : > { %v1118_v63 = vpop.xlane.xlu2 %1117  ;;  %v1112_v3 = vpop.xlane.xlu1 %1111 }
 0x3ed   : > { %2142 = vrcp.f32 %v1118_v63 }
 0x3ee   : > { %2144 = vrcp.f32 %v1106_v59 }
 0x3ef   : > { %2146 = vrcp.f32 %v1109_v60 }
 0x3f0   : > { %2148 = vrcp.f32 %v1121_v62 }
 0x3f1   : > { %v1217_v7 = vpop.f32.mrf.mxu3  ;;  %2150 = vrcp.f32 %v1112_v3 }
 0x3f2   : > { %2152 = vrcp.f32 %v1124_v61 }
 0x3f3   : > { %v2143_v2 = vpop.eup %2142  ;;  %v1161_v8 = vpop.f32.mrf.mxu1 }
 0x3f4   : > { %v2145_v4 = vpop.eup %2144  ;;  %v1260_v6 = vmul.f32 %v2143_v2, %v1215_v0  ;;  %v1115_v18 = vpop.xlane.xlu2 %1114 }
 0x3f5   : > { %v1256_v5 = vmul.f32 %v2145_v4, %v1159_v1  ;;  %v2147_v9 = vpop.eup %2146  ;;  %2154 = vrcp.f32 %v1115_v18  ;;  %v1127_v28 = vpop.xlane.xlu0 %1126 }
 0x3f6   : > { %v2149_v11 = vpop.eup %2148  ;;  %v1257_v13 = vmul.f32 %v2147_v9, %v1161_v8  ;;  %v1264_v16 = vrot.slane %v1260_v6, 4  ;;  %2156 = vrcp.f32 %v1127_v28 }
 0x3f7   : > { %v1261_v12 = vmul.f32 %v2149_v11, %v1217_v7  ;;  %v1266_v15 = vrot.slane %v1256_v5, 4  ;;  %v2151_v19 = vpop.eup %2150 }
 0x3f8   : > { %v1322_v21 = vrot.slane %v1257_v13, 4  ;;  %v1265_v23 = vsel %vm690_vm9, %v1264_v16, %v1256_v5  ;;  %v2153_v26 = vpop.eup %2152 }
 0x3f9   : > { %v1267_v17 = vsel %vm690_vm9, %v1260_v6, %v1266_v15  ;;  %v1320_v20 = vrot.slane %v1261_v12, 4  ;;  %v1271_v32 = vperm.slane %v1265_v23, %v2441_v14 }
 0x3fa   : > { %v1275_v27 = vperm.slane %v1267_v17, %v2441_v14  ;;  %v1323_v34 = vsel %vm690_vm9, %v1261_v12, %v1322_v21 }
 0x3fb   : > { %v1321_v33 = vsel %vm690_vm9, %v1320_v20, %v1257_v13  ;;  %v1331_v40 = vperm.slane %v1323_v34, %v2441_v14  ;;  %v2155_v42 = vpop.eup %2154  ;;  %v1290_v44 = vrot.slane %v1271_v32, 4 }
 0x3fc   : > { %v1302_v38 = vrot.slane %v1275_v27, 4  ;;  %v1327_v39 = vperm.slane %v1321_v33, %v2441_v14  ;;  %v2157_v54 = vpop.eup %2156 }
 0x3fd   : > { %v1358_v60 = vrot.slane %v1331_v40, 4 }
 0x3fe   : > { %v1346_v59 = vrot.slane %v1327_v39, 4 }
 0x401   : > { %v1187_v22 = vpop.f32.mrf.mxu2 }
 0x402   : > { %v1258_v24 = vmul.f32 %v2151_v19, %v1187_v22 }
 0x403   : > { %v1243_v29 = vpop.f32.mrf.mxu0 }
 0x404   : > { %v1278_v25 = vrot.slane %v1258_v24, 4  ;;  %v1262_v30 = vmul.f32 %v2153_v26, %v1243_v29 }
 0x406   : > { %v1276_v35 = vrot.slane %v1262_v30, 4  ;;  %v1279_v36 = vsel %vm690_vm9, %v1262_v30, %v1278_v25 }
 0x407   : > { %v1287_v37 = vperm.slane %v1279_v36, %v2441_v14 }
 0x408   : > { %v1277_v41 = vsel %vm690_vm9, %v1276_v35, %v1258_v24 }
 0x409   : > { %v1283_v43 = vperm.slane %v1277_v41, %v2441_v14  ;;  %v1300_v45 = vrot.slane %v1287_v37, 4  ;;  %v1303_v46 = vsel %vm690_vm9, %v1287_v37, %v1302_v38  ;;  %v1189_v47 = vpop.f32.mrf.mxu2 }
 0x40a   : > { %v1311_v48 = vperm.slane %v1303_v46, %v2451_v31  ;;  %v1259_v49 = vmul.f32 %v2155_v42, %v1189_v47 }
 0x40b   : > { %v1288_v50 = vrot.slane %v1283_v43, 4  ;;  %v1291_v51 = vsel %vm690_vm9, %v1283_v43, %v1290_v44  ;;  %v1301_v52 = vsel %vm690_vm9, %v1300_v45, %v1275_v27  ;;  %v1245_v53 = vpop.f32.mrf.mxu0 }
 0x40c   : > { %v1299_v55 = vperm.slane %v1291_v51, %v2451_v31  ;;  %v1307_v56 = vperm.slane %v1301_v52, %v2451_v31  ;;  %v1318_v57 = vrot.slane %v1311_v48, 4  ;;  %v1334_v58 = vrot.slane %v1259_v49, 4 }
 0x40d   : > { %v1289_v61 = vsel %vm690_vm9, %v1288_v50, %v1271_v32  ;;  %v1263_v62 = vmul.f32 %v2157_v54, %v1245_v53 }
 0x40e   : > { %v1295_v63 = vperm.slane %v1289_v61, %v2451_v31  ;;  %v1314_v0 = vrot.slane %v1299_v55, 4  ;;  %v1316_v1 = vrot.slane %v1307_v56, 4  ;;  %v1319_v2 = vsel %vm690_vm9, 0.0, %v1318_v57 }
 0x40f   : > { %v1387_v3 = vsel %vm690_vm9, %v1318_v57, %v1307_v56  ;;  %v1392_v4 = vrot.slane %v1319_v2, 4  ;;  %v1332_v5 = vrot.slane %v1263_v62, 4  ;;  %v1335_v6 = vsel %vm690_vm9, %v1263_v62, %v1334_v58 }
 0x410   : > { %v1312_v7 = vrot.slane %v1295_v63, 4  ;;  %v1315_v8 = vsel %vm690_vm9, 0.0, %v1314_v0  ;;  %v1317_v9 = vsel %vm690_vm9, 0.0, %v1316_v1  ;;  %v1391_v11 = vperm.slane %v1387_v3, %v2441_v14 }
 0x411   : > { %v1381_v12 = vrot.slane %v1315_v8, 4  ;;  %v1333_v13 = vsel %vm690_vm9, %v1332_v5, %v1259_v49  ;;  %v1343_v15 = vperm.slane %v1335_v6, %v2441_v14  ;;  %v1376_v16 = vsel %vm690_vm9, %v1314_v0, %v1295_v63 }
 0x412   : > { %v1339_v17 = vperm.slane %v1333_v13, %v2441_v14  ;;  %v1313_v18 = vsel %vm690_vm9, 0.0, %v1312_v7  ;;  %v1380_v19 = vperm.slane %v1376_v16, %v2441_v14  ;;  %v1393_v20 = vsel %vm690_vm9, %v1392_v4, %v1317_v9 }
 0x413   : > { %v1356_v21 = vrot.slane %v1343_v15, 4  ;;  %v1359_v22 = vsel %vm690_vm9, %v1343_v15, %v1358_v60  ;;  %v1382_v23 = vsel %vm690_vm9, %v1381_v12, %v1313_v18  ;;  %v1397_v24 = vperm.slane %v1393_v20, %v2441_v14 }
 0x414   : > { %v1344_v26 = vrot.slane %v1339_v17, 4  ;;  %v1347_v27 = vsel %vm690_vm9, %v1339_v17, %v1346_v59  ;;  %v1367_v28 = vperm.slane %v1359_v22, %v2451_v31  ;;  %v1386_v29 = vperm.slane %v1382_v23, %v2441_v14 }
 0x415   : > { %v1355_v25 = vperm.slane %v1347_v27, %v2451_v31  ;;  %v1357_v30 = vsel %vm690_vm9, %v1356_v21, %v1331_v40  ;;  %v1400_v32 = vrot.slane %v1380_v19, 4  ;;  %v1412_v33 = vrot.slane %v1391_v11, 4 }
 0x416   : > { %v1345_v34 = vsel %vm690_vm9, %v1344_v26, %v1327_v39  ;;  %v1363_v35 = vperm.slane %v1357_v30, %v2451_v31  ;;  %v1374_v36 = vrot.slane %v1367_v28, 4  ;;  %v1398_v37 = vrot.slane %v1386_v29, 4 }
 0x417   : > { %v1351_v38 = vperm.slane %v1345_v34, %v2451_v31  ;;  %v1370_v41 = vrot.slane %v1355_v25, 4  ;;  %v1401_v42 = vsel %vm690_vm9, %v1386_v29, %v1400_v32  ;;  %v1413_v43 = vsel %vm690_vm9, %v1397_v24, %v1412_v33  ;;  %v2004_v34 = vld [vmem:[%s2773_s7] sm:$0xff] }
 0x418   : > { %v1372_v44 = vrot.slane %v1363_v35, 4  ;;  %v1375_v45 = vsel %vm690_vm9, 0.0, %v1374_v36  ;;  %v1441_v40 = vsel %vm690_vm9, %v1374_v36, %v1363_v35  ;;  %v1409_v46 = vperm.slane %v1401_v42, %v2451_v31 }
 0x419   : > { %v1368_v47 = vrot.slane %v1351_v38, 4  ;;  %v1371_v39 = vsel %vm690_vm9, 0.0, %v1370_v41  ;;  %v1445_v48 = vperm.slane %v1441_v40, %v2441_v14  ;;  %v1446_v49 = vrot.slane %v1375_v45, 4 }
 0x41a   : > { %v1373_v50 = vsel %vm690_vm9, 0.0, %v1372_v44  ;;  %v1435_v51 = vrot.slane %v1371_v39, 4  ;;  %v1421_v52 = vperm.slane %v1413_v43, %v2451_v31  ;;  %v1430_v53 = vsel %vm690_vm9, %v1370_v41, %v1351_v38 }
 0x41b   : > { %v1369_v54 = vsel %vm690_vm9, 0.0, %v1368_v47  ;;  %v1434_v55 = vperm.slane %v1430_v53, %v2441_v14  ;;  %v1447_v56 = vsel %vm690_vm9, %v1446_v49, %v1373_v50  ;;  %v1466_v57 = vrot.slane %v1445_v48, 4 }
 0x41c   : > { %v1436_v58 = vsel %vm690_vm9, %v1435_v51, %v1369_v54  ;;  %v1451_v59 = vperm.slane %v1447_v56, %v2441_v14  ;;  %v1399_v62 = vsel %vm690_vm9, %v1398_v37, %v1380_v19  ;;  %v1410_v63 = vrot.slane %v1397_v24, 4  ;;  %v2115_v51 = vld [vmem:[%s2774_s8] ss:$0 sm:$0xff] }
 0x41d   : > { %v1440_v60 = vperm.slane %v1436_v58, %v2441_v14  ;;  %v1454_v61 = vrot.slane %v1434_v55, 4  ;;  %v1426_v0 = vrot.slane %v1421_v52, 4  ;;  %v1428_v2 = vrot.slane %v1409_v46, 4  ;;  %v2166_v54 = vld [vmem:[%s2401_s29] sm:$0xff] }
 0x41e   : > { %v1467_v1 = vsel %vm690_vm9, %v1451_v59, %v1466_v57  ;;  %v1405_v3 = vperm.slane %v1399_v62, %v2451_v31  ;;  %v1411_v6 = vsel %vm690_vm9, %v1410_v63, %v1391_v11  ;;  %v1464_v9 = vrot.slane %v1451_v59, 4  ;;  %v2167_v59 = vld [vmem:[%s2401_s29 + $0x8] sm:$0xff]  ;;  %s2016_s29 = sshll.u32 %s2238_s21, 4  ;;  %s1755_s21 = scalar_lea.sflag [#allocation3], %s540_s24 }
 0x41f   : > { %v1455_v4 = vsel %vm690_vm9, %v1440_v60, %v1454_v61  ;;  %v1475_v5 = vperm.slane %v1467_v1, %v2451_v31  ;;  %v1452_v7 = vrot.slane %v1440_v60, 4  ;;  %v1417_v14 = vperm.slane %v1411_v6, %v2451_v31  ;;  %s1768_s26 = scalar_lea.hbm %s2781_s15, %s2016_s29 }
 0x420   : > { %v1463_v8 = vperm.slane %v1455_v4, %v2451_v31  ;;  %v1424_v17 = vrot.slane %v1405_v3, 4  ;;  %v1427_v19 = vsel %vm690_vm9, %v1426_v0, %v1409_v46  ;;  %v1429_v11 = vsel %vm690_vm9, %v1421_v52, %v1428_v2 }
 0x421   : > { %v1480_v12 = vrot.slane %v1475_v5, 4  ;;  %v1453_v13 = vsel %vm690_vm9, %v1452_v7, %v1434_v55  ;;  %v1422_v16 = vrot.slane %v1417_v14, 4  ;;  %v1465_v21 = vsel %vm690_vm9, %v1464_v9, %v1445_v48 }
 0x422   : > { %v1482_v15 = vrot.slane %v1463_v8, 4  ;;  %v1459_v18 = vperm.slane %v1453_v13, %v2451_v31  ;;  %v1471_v24 = vperm.slane %v1465_v21, %v2451_v31  ;;  %v1425_v29 = vsel %vm690_vm9, %v1417_v14, %v1424_v17  ;;  %v2005_v31 = vld [vmem:[%s2773_s7 + $0x8] sm:$0xff]  ;;  %v2006_v13 = vld [vmem:[%s2777_s11] sm:$0xff] }
 0x423   : > { %v1481_v20 = vsel %vm690_vm9, %v1480_v12, %v1463_v8  ;;  %v1423_v28 = vsel %vm690_vm9, %v1422_v16, %v1405_v3  ;;  %1545 = vmatpush.bf16.msra.mxu1 %v2005_v31  ;;  %v2007_v12 = vld [vmem:[%s2777_s11 + $0x8] sm:$0xff] }
 0x424   : > { %v2102_v22 = vpack.i.bf16 %v1481_v20, %v1427_v19  ;;  %v1483_v23 = vsel %vm690_vm9, %v1475_v5, %v1482_v15  ;;  %v1478_v26 = vrot.slane %v1459_v18, 4  ;;  %v1476_v25 = vrot.slane %v1471_v24, 4  ;;  %1641 = vmatpush.bf16.msra.mxu2 %v2007_v12 }
 0x425   : > { %v2107_v27 = vpack.i.bf16 %v1483_v23, %v1429_v11 }
 0x426   : > { %2103 = vrot.lane.b32.xlu1 %v2102_v22, %s2254_s3  ;;  %v1479_v30 = vsel %vm690_vm9, %v1471_v24, %v1478_v26  ;;  %v1477_v33 = vsel %vm690_vm9, %v1476_v25, %v1459_v18  ;;  %s2188_s3 = scalar_lea.hbm %s2781_s15, 32 }
 0x427   : > { %2108 = vrot.lane.b32.xlu2 %v2107_v27, %s2255_s22  ;;  %v2097_v32 = vpack.i.bf16 %v1479_v30, %v1425_v29  ;;  %1546 = vmatpush.bf16.msra.mxu1 %v2004_v34 }
 0x428   : > { %1642 = vmatpush.bf16.msra.mxu2 %v2006_v13 }
 0x429   : > { %2098 = vrot.lane.b32.xlu0 %v2097_v32, %s2784_s17  ;;  %s1771_s17 = sshll.u32 %s1768_s26, 4  ;;  %s1772_s17 = int_to_ptr.hbm [resolvable:$true] %s1771_s17 }
 0x42a   : > { %s2182_s25 = sshra.s32 %s1772_s17, 4  ;;  %s2183_s25 = int_to_ptr.hbm [resolvable:$true] %s2182_s25 }
 0x42b   : > { %s2184_s0 = scalar_lea.hbm %s2183_s25, 16  ;;  %p2189_p1 = scmp.lt.s32.totalorder %s2183_s25, %s2781_s15 }
 0x42c   : > { %p2185_p12 = scmp.ne.s32.totalorder %s2183_s25, %s2184_s0  ;;  %p2190_p2 = scmp.lt.s32.totalorder %s2188_s3, %s2184_s0 }
 0x42e   : > { %p2186_p13 = pnand %p2185_p12, %p2378_p4  ;;  %p2191_p3 = por %p2190_p2, %p2189_p1 }
 0x430   : > { %p2187_p0 = pneg %p2186_p13 }
 0x432   : > { %p2192_p5 = pnand %p2191_p3, %p2187_p0 }
 0x481   : > { %v2109_v36 = vpop.permute.xlu2 %2108 }
 0x482   : > { %v2111_v44 = vunpack.i.h.bf16 %v2109_v36  ;;  %v2110_v45 = vunpack.i.l.bf16 %v2109_v36 }
 0x498   : > { %v2104_v35 = vpop.permute.xlu1 %2103 }
 0x499   : > { %v2106_v42 = vunpack.i.h.bf16 %v2104_v35  ;;  %v2105_v43 = vunpack.i.l.bf16 %v2104_v35 }
 0x49b   : > { %v2099_v37 = vpop.permute.xlu0 %2098 }
 0x49c   : > { %v2101_v38 = vunpack.i.h.bf16 %v2099_v37  ;;  %v2100_v41 = vunpack.i.l.bf16 %v2099_v37 }
 0x49e   : > { %v1509_v40 = vsel %vm944_vm8, %v1477_v33, %v2101_v38  ;;  %v1508_v46 = vsel %vm944_vm8, %v1423_v28, %v2100_v41  ;;  %v2117_v33 = vld [vmem:[%s2776_s10] ss:$0 sm:$0xff]  ;;  %v2015_v41 = vld [vmem:[%s2779_s13 + $0x38] sm:$0xff] }
 0x49f   : > { %v1511_v47 = vsel %vm1055_vm10, %v1509_v40, %v2106_v42  ;;  %v1510_v39 = vsel %vm1055_vm10, %v1508_v46, %v2105_v43  ;;  %1736 = vmatpush.bf16.msra.mxu3 %v2015_v41  ;;  %v2014_v42 = vld [vmem:[%s2779_s13 + $0x30] sm:$0xff]  ;;  %v2013_v43 = vld [vmem:[%s2779_s13 + $0x28] sm:$0xff]  ;;  %v2118_v46 = vld [vmem:[%s2778_s12] ss:$0 sm:$0xff] }
 0x4a0   : > { %v1514_v48 = vsel %vm1512_vm11, %v1511_v47, %v2111_v44  ;;  %v1513_v49 = vsel %vm1512_vm11, %v1510_v39, %v2110_v45  ;;  %v2012_v44 = vld [vmem:[%s2779_s13 + $0x20] sm:$0xff]  ;;  %v2011_v45 = vld [vmem:[%s2779_s13 + $0x18] sm:$0xff]  ;;  %v2010_v40 = vld [vmem:[%s2779_s13 + $0x10] sm:$0xff] }
 0x4a1   : > { %v1515_v50 = vpack.c.bf16 %v1514_v48, %v1513_v49  ;;  %v2009_v39 = vld [vmem:[%s2779_s13 + $0x8] sm:$0xff] }
 0x4a3   : > { %1944 = vmatmul.msk.bf16.vlgmr.msra.gmra.mxu1 %vm569_vm0, %v1515_v50  ;;  %1737 = vmatpush.bf16.msra.mxu3 %v2014_v42  ;;  %v2008_v50 = vld [vmem:[%s2779_s13] sm:$0xff] }
 0x4a7   : > { %1738 = vmatpush.bf16.msra.mxu3 %v2013_v43 }
 0x4ab   : > { %1739 = vmatpush.bf16.msra.mxu3 %v2012_v44 }
 0x4af   : > { %1740 = vmatpush.bf16.msra.mxu3 %v2011_v45 }
 0x4b3   : > { %1741 = vmatpush.bf16.msra.mxu3 %v2010_v40 }
 0x4b7   : > { %1742 = vmatpush.bf16.msra.mxu3 %v2009_v39 }
 0x4bb   : > { %1743 = vmatpush.bf16.msra.mxu3 %v2008_v50 }
 0x520   : > { %v1548_v52 = vpop.f32.mrf.mxu1 }
 0x521   : > { %v1549_v53 = vadd.f32 %v2115_v51, %v1548_v52 }
 0x523   : > { %v2664_v55 = vadd.f32 %v2166_v54, %v1549_v53 }
 0x525   : > { %v1557_v56 = vsel %vm569_vm0, %v2664_v55, 0.0 }
 0x526   : > { %1558 = vadd.xlane.f32.xlu0 %v1557_v56 }
 0x528   : > { %v1550_v57 = vpop.f32.mrf.mxu1 }
 0x529   : > { %v1551_v58 = vadd.f32 %v2115_v51, %v1550_v57 }
 0x52b   : > { %v2669_v60 = vadd.f32 %v2167_v59, %v1551_v58 }
 0x52d   : > { %v1560_v61 = vsel %vm569_vm0, %v2669_v60, 0.0 }
 0x52e   : > { %1561 = vadd.xlane.f32.xlu1 %v1560_v61 }
 0x599   : > { %v1559_v62 = vpop.xlane.xlu0 %1558 }
 0x59a   : > { %v1563_v63 = vmul.f32 %v1559_v62, %v2407_v10 }
 0x59c   : > { %v1565_v0 = vsub.f32 %v2664_v55, %v1563_v63 }
 0x59e   : > { %v1567_v1 = vmul.f32 %v1565_v0, %v1565_v0 }
 0x5a0   : > { %v1569_v2 = vsel %vm569_vm0, %v1567_v1, 0.0 }
 0x5a1   : > { %v1562_v3 = vpop.xlane.xlu1 %1561  ;;  %1570 = vadd.xlane.f32.xlu2 %v1569_v2 }
 0x5a2   : > { %v1564_v4 = vmul.f32 %v1562_v3, %v2407_v10 }
 0x5a4   : > { %v1566_v5 = vsub.f32 %v2669_v60, %v1564_v4 }
 0x5a6   : > { %v1568_v6 = vmul.f32 %v1566_v5, %v1566_v5 }
 0x5a8   : > { %v1572_v7 = vsel %vm569_vm0, %v1568_v6, 0.0 }
 0x5a9   : > { %1573 = vadd.xlane.f32.xlu0 %v1572_v7 }
 0x614   : > { %v1571_v8 = vpop.xlane.xlu2 %1570 }
 0x615   : > { %v1575_v14 = vmul.f32 %v1571_v8, %v2407_v10 }
 0x617   : > { %v1577_v9 = vadd.f32 1e-05, %v1575_v14  ;;  %v2119_v14 = vld [vmem:[%s2780_s14] ss:$0 sm:$0xff] }
 0x619   : > { %2158 = vrsqrt.f32 %v1577_v9  ;;  %vm1585_vm13 = vweird.f32 %v1577_v9 }
 0x61c   : > { %v1574_v15 = vpop.xlane.xlu0 %1573 }
 0x61d   : > { %v1576_v16 = vmul.f32 %v1574_v15, %v2407_v10  ;;  %v2116_v10 = vld [vmem:[%s2775_s9] ss:$0 sm:$0xff] }
 0x61f   : > { %v2159_v17 = vpop.eup %2158  ;;  %v1578_v18 = vadd.f32 1e-05, %v1576_v16 }
 0x620   : > { %v1580_v19 = vmul.f32 %v2159_v17, %v1577_v9  ;;  %vm1586_vm12 = vweird.f32 %v2159_v17 }
 0x621   : > { %2160 = vrsqrt.f32 %v1578_v18  ;;  %vm1587_vm14 = vmor %vm1585_vm13, %vm1586_vm12  ;;  %vm1595_vm1 = vweird.f32 %v1578_v18 }
 0x622   : > { %v1581_v20 = vmul.f32 %v2159_v17, %v1580_v19 }
 0x624   : > { %v1582_v11 = vmul.f32 0.5, %v1581_v20 }
 0x626   : > { %v1583_v21 = vsub.f32 1.5, %v1582_v11 }
 0x627   : > { %v2161_v22 = vpop.eup %2160 }
 0x628   : > { %v1584_v23 = vmul.f32 %v2159_v17, %v1583_v21  ;;  %v1590_v24 = vmul.f32 %v2161_v22, %v1578_v18  ;;  %vm1596_vm15 = vweird.f32 %v2161_v22 }
 0x629   : > { %vm1597_vm2 = vmor %vm1595_vm1, %vm1596_vm15 }
 0x62a   : > { %v1591_v26 = vmul.f32 %v2161_v22, %v1590_v24  ;;  %v1588_v27 = vsel %vm1587_vm14, %v2159_v17, %v1584_v23 }
 0x62b   : > { %v1599_v25 = vmul.f32 %v1588_v27, %v1565_v0 }
 0x62c   : > { %v1592_v28 = vmul.f32 0.5, %v1591_v26 }
 0x62d   : > { %v1604_v31 = vmul.f32 %v2116_v10, %v1599_v25 }
 0x62e   : > { %v1593_v29 = vsub.f32 1.5, %v1592_v28 }
 0x62f   : > { %v1609_v36 = vadd.f32 %v2117_v33, %v1604_v31 }
 0x630   : > { %v1594_v30 = vmul.f32 %v2161_v22, %v1593_v29 }
 0x632   : > { %v1598_v32 = vsel %vm1597_vm2, %v2161_v22, %v1594_v30 }
 0x633   : > { %v1600_v34 = vmul.f32 %v1598_v32, %v1566_v5 }
 0x635   : > { %v1605_v35 = vmul.f32 %v2116_v10, %v1600_v34 }
 0x637   : > { %v1610_v37 = vadd.f32 %v2117_v33, %v1605_v35 }
 0x639   : > { %v1611_v38 = vpack.c.bf16 %v1610_v37, %v1609_v36 }
 0x63b   : > { %1953 = vmatmul.msk.bf16.vlgmr.msra.gmra.mxu2 %vm569_vm0, %v1611_v38 }
 0x6be   : > { %v1644_v47 = vpop.f32.mrf.mxu2 }
 0x6bf   : > { %v1645_v48 = vadd.f32 %v2118_v46, %v1644_v47 }
 0x6c1   : > { %v1651_v49 = vmul.f32 0.044715, %v1645_v48  ;;  %v1649_v3 = vmul.f32 0.5, %v1645_v48 }
 0x6c3   : > { %v1653_v51 = vmul.f32 %v1651_v49, %v1645_v48 }
 0x6c5   : > { %v1655_v52 = vmul.f32 %v1653_v51, %v1645_v48 }
 0x6c6   : > { %v1646_v53 = vpop.f32.mrf.mxu2 }
 0x6c7   : > { %v1657_v54 = vadd.f32 %v1655_v52, %v1645_v48  ;;  %v1647_v56 = vadd.f32 %v2118_v46, %v1646_v53 }
 0x6c9   : > { %v1652_v57 = vmul.f32 0.044715, %v1647_v56  ;;  %v1659_v58 = vmul.f32 0.7978846, %v1657_v54  ;;  %v1650_v4 = vmul.f32 0.5, %v1647_v56 }
 0x6cb   : > { %v1654_v59 = vmul.f32 %v1652_v57, %v1647_v56  ;;  %2162 = vtanh.f32 %v1659_v58 }
 0x6cd   : > { %v1656_v61 = vmul.f32 %v1654_v59, %v1647_v56 }
 0x6cf   : > { %v1658_v62 = vadd.f32 %v1656_v61, %v1647_v56 }
 0x6d1   : > { %v1660_v63 = vmul.f32 0.7978846, %v1658_v62  ;;  %v2163_v0 = vpop.eup %2162 }
 0x6d2   : > { %v1663_v1 = vadd.f32 1.0, %v2163_v0 }
 0x6d3   : > { %2164 = vtanh.f32 %v1660_v63 }
 0x6d4   : > { %v1665_v6 = vmul.f32 %v1663_v1, %v1649_v3 }
 0x6d9   : > { %v2165_v2 = vpop.eup %2164 }
 0x6da   : > { %v1664_v5 = vadd.f32 1.0, %v2165_v2 }
 0x6dc   : > { %v1666_v7 = vmul.f32 %v1664_v5, %v1650_v4 }
 0x6de   : > { %v1667_v8 = vpack.c.bf16 %v1666_v7, %v1665_v6 }
 0x6e0   : > { %1744 = vmatmul.bf16.vlgmr.msra.gmra.mxu3 %v1667_v8 }
 0x763   : > { %v1745_v9 = vpop.f32.mrf.mxu3 }
 0x764   : > { %v1746_v12 = vadd.f32 %v2119_v14, %v1745_v9 }
 0x766   : > { %v1750_v13 = vadd.f32 %v1746_v12, %v2664_v55 }
 0x768   : > { %1752 = vst.msk [vmem:[%s542_s5] sm:$0xff] %vm569_vm0, %v1750_v13 }
 0x76b   : > { %v1747_v15 = vpop.f32.mrf.mxu3 }
 0x76c   : > { %v1748_v16 = vadd.f32 %v2119_v14, %v1747_v15 }
 0x76e   : > { %v1751_v17 = vadd.f32 %v1748_v16, %v2669_v60 }
 0x770   : > { %1753 = vst.msk [vmem:[%s542_s5 + $0x8] sm:$0xff] %vm569_vm0, %v1751_v17 }
 0x771   : > { %2195 = shalt.err (!%p2192_p5)
}
 0x772   : > { %s2257_s24 = smov 128   ;;  %s2797_s5 = smov 8  }
 0x773   : > { %2017 = dma.vmem_to_hbm [thread:$0]  (%p2378_p4), %s1770_s27, 256, %s1772_s17, %s1755_s21, %s2257_s24, %s2257_s24, %s2797_s5  }
 0x774 PF: > { %p2023_p6 = scmp.ge.s32.totalorder %s2246_s23, 2  ;;  %s1786_s4 = sand.u32 1, %s2226_s18  }
 0x775   : > { %s1787_s29 = scalar_lea.sflag [#allocation3], %s1786_s4 }
 0x776   : > { %p2020_p7 = pnand %p2023_p6, %p2385_p8 }
 0x778   : > { %p2021_p9 = pneg %p2020_p7 }
 0x77a   : > { %2221 = dma.done.wait (%p2021_p9), %s1787_s29, 256  }
 0x77b   : > { %2223 = vsyncadd (%p2021_p9), %s1787_s29, 4294967040  ;;  %s28_s23 = sadd.s32 1, %s2246_s23   ;;  %s2798_s21 = sld [smem:[#allocation5_spill]] }
 0x77c   : > { %p25_p10 = scmp.ge.s32.totalorder %s28_s23, 4   ;;  %s2799_s22 = sld [smem:[#allocation6_spill]] }
 0x77d   : > { %s2800_s18 = smov %s2230_s19  ;;  %s2801_s19 = smov %s2234_s20 }
 0x77e   : > { %s2802_s20 = smov %s2391_s16  ;;  %27 = sbr.rel (!%p25_p10) target bundleno = 9 (0x9), region = 121 }
 0x783   :  { %1793 = vsyncpa [#allocation3], 1 }
 0x784   :  { %1795 = vsyncpa [#allocation3 + $0x1], 1 }

</bundles_post_ra>
